<compile_context>
chip_gen: v7x
topology: tpu7x:2x2x1
jax: 0.10.0
libtpu: 0.0.40
codegen_flags: <defaults>
</compile_context>

<pallas_src>
import functools
import math

import jax
import jax.numpy as jnp
from jax.experimental import pallas as pl
from jax.experimental.pallas import tpu as pltpu


# ------------------------------ Pallas kernel ------------------------------ #

def elm_block_kernel(x_ref, wconv_ref, wfc_ref, bfc_ref, o_ref, *, W):
    """One batch block per grid step.

    x_ref    : (Bblk, Cin, H*W)   flat NCHW image block (no host padding)
    wconv_ref: (F, 9*Cin)         conv weight, tap-major / channel-minor
    wfc_ref  : (C, F*H*W)         fc weight in its native PyTorch layout
    bfc_ref  : (1, C)             fc bias
    o_ref    : (Bblk, C)          logits for this block
    """
    Bblk, Cin, HW = x_ref.shape
    F_maps, K = wconv_ref.shape

    x = x_ref[...]                                        # (Bblk, Cin, HW)

    # Column index of every flattened pixel, for the horizontal edge masks.
    pos = jax.lax.broadcasted_iota(jnp.int32, (1, 1, HW), 2)
    wcol = (pos & (W - 1)) if (W & (W - 1)) == 0 else (pos % W)
    left_ok = wcol >= 1          # tap dw = -1 reads column w-1
    right_ok = wcol <= W - 2     # tap dw = +1 reads column w+1

    zeros1 = jnp.zeros((Bblk, Cin, 1), x.dtype)
    zerosW = jnp.zeros((Bblk, Cin, W), x.dtype)

    def shift_down(a, zpad):     # out[.., q] = a[.., q - k], zero-filled head
        k = zpad.shape[-1]
        return jnp.concatenate([zpad, a[:, :, :HW - k]], axis=-1)

    def shift_up(a, zpad):       # out[.., q] = a[.., q + k], zero-filled tail
        k = zpad.shape[-1]
        return jnp.concatenate([a[:, :, k:], zpad], axis=-1)

    # The 3 horizontal (dw) variants, computed once and reused for all dh.
    x_l = jnp.where(left_ok, shift_down(x, zeros1), 0.0)   # reads (h, w-1)
    x_c = x                                                # reads (h, w  )
    x_r = jnp.where(right_ok, shift_up(x, zeros1), 0.0)    # reads (h, w+1)

    # Stacked im2col operand: rows ordered (kh, kw, channel) to match
    # wconv_ref.  Row shifts by +-W use zero fill, which reproduces the
    # padding=1 behaviour at the top/bottom image edges (no extra masks).
    taps = []
    taps += [shift_down(v, zerosW) for v in (x_l, x_c, x_r)]   # dh = -1
    taps += [x_l, x_c, x_r]                                    # dh =  0
    taps += [shift_up(v, zerosW) for v in (x_l, x_c, x_r)]     # dh = +1
    cols = jnp.concatenate(taps, axis=1)                  # (Bblk, 9*Cin, HW)

    # ---- conv(3x3, pad=1): ONE stacked K=9*Cin dot, batched over the block.
    wconv_b = jnp.broadcast_to(wconv_ref[...][None], (Bblk, F_maps, K))
    z = jax.lax.dot_general(
        wconv_b, cols,
        dimension_numbers=(((2,), (1,)), ((0,), (0,))),
        preferred_element_type=jnp.float32)               # (Bblk, F, HW)
    h = jnp.maximum(z, 0.0)                               # ReLU

    # ---- flatten(NCHW) + FC as a single (Bblk, F*HW) x (C, F*HW)^T dot ---- #
    # Lane index f*HW + p matches PyTorch's x.view(N, -1) ordering, so fc_w is
    # used in its native layout (contraction on the lane axis of both
    # operands -- the standard "NT" MXU pattern), accumulated in f32.
    h_flat = jnp.concatenate([h[:, f, :] for f in range(F_maps)], axis=1)
    out = jax.lax.dot_general(
        h_flat, wfc_ref[...],
        dimension_numbers=(((1,), (1,)), ((), ())),
        preferred_element_type=jnp.float32)               # (Bblk, C)
    out = out + bfc_ref[...].astype(jnp.float32)
    o_ref[...] = out.astype(o_ref.dtype)


# ------------------------------ JAX wrappers -------------------------------- #

def prepare_elm_params(conv_w, fc_w, fc_b):
    """One-time host-side weight prep (hoisted out of the per-call path).

    conv OIHW (F, Cin, KH, KW) -> (F, KH*KW*Cin), tap-major / channel-minor.
    fc_w (C, F*H*W) and fc_b are used as-is (already lane-dense).
    """
    F_maps, Cin, KH, KW = conv_w.shape
    wconv_r = jnp.transpose(conv_w, (0, 2, 3, 1)).reshape(F_maps, KH * KW * Cin)
    return wconv_r, fc_w, fc_b.reshape(1, -1)


@functools.partial(jax.jit, static_argnames=("block_b",))
def elm_forward(x_nchw, wconv_r, wfc, bfc, block_b=64):
    """Forward pass.

    x_nchw : (B, Cin, H, W) float32
    wconv_r, wfc, bfc : outputs of prepare_elm_params (done once at init)
    """
    B, Cin, H, W = x_nchw.shape
    F_maps, K = wconv_r.shape
    C = wfc.shape[0]
    HW = H * W

    # Batch-block size: sized so the in-kernel im2col (~9x the input block)
    # plus activations stay well under the per-core VMEM budget on every
    # generation (v7x: 64 MiB/TC).  block_b=64 -> ~15-20 MiB working set; with
    # multiple blocks the "parallel" grid axis shards them across TensorCores.
    bb = min(block_b, B)
    n_blocks = pl.cdiv(B, bb)
    Bp = n_blocks * bb

    x_flat = x_nchw.reshape(B, Cin, HW)       # free reshape, no pad round-trip
    if Bp != B:
        x_flat = jnp.pad(x_flat, ((0, Bp - B), (0, 0), (0, 0)))

    kernel = functools.partial(elm_block_kernel, W=W)
    out = pl.pallas_call(
        kernel,
        out_shape=jax.ShapeDtypeStruct((Bp, C), x_nchw.dtype),
        grid_spec=pltpu.PrefetchScalarGridSpec(
            num_scalar_prefetch=0,
            grid=(n_blocks,),
            in_specs=[
                pl.BlockSpec((bb, Cin, HW), lambda i: (i, 0, 0)),
                # Grid-invariant weight/bias blocks: fetched once per call.
                pl.BlockSpec((F_maps, K), lambda i: (0, 0)),
                pl.BlockSpec((C, F_maps * HW), lambda i: (0, 0)),
                pl.BlockSpec((1, C), lambda i: (0, 0)),
            ],
            out_specs=pl.BlockSpec((bb, C), lambda i: (i, 0)),
        ),
        compiler_params=pltpu.CompilerParams(
            dimension_semantics=("parallel",)),
    )(x_flat, wconv_r, wfc, bfc)
    return out[:B]


# ------------------------------- reference --------------------------------- #

def ref_forward(x_nchw, conv_w, fc_w, fc_b):
    y = jax.lax.conv_general_dilated(
        x_nchw, conv_w, window_strides=(1, 1), padding=((1, 1), (1, 1)),
        dimension_numbers=("NCHW", "OIHW", "NCHW"))
    y = jnp.maximum(y, 0.0)
    y = y.reshape(y.shape[0], -1)
    return y @ fc_w.T + fc_b


# --------------------------------- main ------------------------------------ #

if __name__ == "__main__":
    # Module hyper-parameters (fc layer hard-codes 32x32 spatial).
    input_channels = 3
    num_feature_maps = 8
    num_classes = 10
    H = W = 32
    batch = 2
    std = 0.1

    key = jax.random.PRNGKey(0)
    k_conv, k_fcw, k_fcb, k_x = jax.random.split(key, 4)

    # Fixed random conv weights: randn * std  (as in initialise_fixed_layers).
    conv_w = jax.random.normal(
        k_conv, (num_feature_maps, input_channels, 3, 3), jnp.float32) * std

    # nn.Linear default init: U(-1/sqrt(fan_in), 1/sqrt(fan_in)).
    in_features = num_feature_maps * H * W
    bound = 1.0 / math.sqrt(in_features)
    fc_w = jax.random.uniform(
        k_fcw, (num_classes, in_features), jnp.float32, -bound, bound)
    fc_b = jax.random.uniform(
        k_fcb, (num_classes,), jnp.float32, -bound, bound)

    x = jax.random.normal(k_x, (batch, input_channels, H, W), jnp.float32)

    # Weight prep happens ONCE, outside the per-call forward path.
    params = prepare_elm_params(conv_w, fc_w, fc_b)

    out = jax.block_until_ready(elm_forward(x, *params))
    ref = jax.block_until_ready(ref_forward(x, conv_w, fc_w, fc_b))

    assert out.shape == (batch, num_classes)
    err = jnp.max(jnp.abs(out - ref))
    assert jnp.allclose(out, ref, rtol=2e-4, atol=2e-4), (
        f"mismatch: max abs err {err}")

    print("KERNEL_OK")
</pallas_src>

<mosaic_0001>
module attributes {stable_mosaic.version = 11 : i64} {
  func.func @elm_block_kernel(%arg0: i32, %arg1: memref<2x3x1024xf32, #tpu.memory_space<vmem>>, %arg2: memref<8x27xf32, #tpu.memory_space<vmem>>, %arg3: memref<10x8192xf32, #tpu.memory_space<vmem>>, %arg4: memref<1x10xf32, #tpu.memory_space<vmem>>, %arg5: memref<2x10xf32, #tpu.memory_space<vmem>>) attributes {dimension_semantics = [#tpu.dimension_semantics<parallel>], iteration_bounds = array<i64: 1>, scalar_prefetch = 0 : i64, scratch_operands = 0 : i64, tpu.core_type = #tpu.core_type<tc>, window_params = [{transform_indices = @transform_0, window_bounds = array<i64: 2, 3, 1024>}, {pipeline_mode = #tpu.pipeline_mode<synchronous>, transform_indices = @transform_1, window_bounds = array<i64: 8, 27>}, {pipeline_mode = #tpu.pipeline_mode<synchronous>, transform_indices = @transform_2, window_bounds = array<i64: 10, 8192>}, {pipeline_mode = #tpu.pipeline_mode<synchronous>, transform_indices = @transform_3, window_bounds = array<i64: 1, 10>}, {transform_indices = @transform_4, window_bounds = array<i64: 2, 10>}]} {
    %c0 = arith.constant 0 : index
    %c0_0 = arith.constant 0 : index
    %c0_1 = arith.constant 0 : index
    %0 = vector.load %arg1[%c0, %c0_0, %c0_1] : memref<2x3x1024xf32, #tpu.memory_space<vmem>>, vector<2x3x1024xf32>
    %1 = tpu.iota {dimensions = array<i32: 2>} : vector<1x1x1024xi32>
    %c31_i32 = arith.constant 31 : i32
    %2 = vector.broadcast %c31_i32 : i32 to vector<1x1x1024xi32>
    %3 = arith.andi %1, %2 : vector<1x1x1024xi32>
    %c1_i32 = arith.constant 1 : i32
    %4 = vector.broadcast %c1_i32 : i32 to vector<1x1x1024xi32>
    %5 = arith.cmpi sge, %3, %4 : vector<1x1x1024xi32>
    %c30_i32 = arith.constant 30 : i32
    %6 = vector.broadcast %c30_i32 : i32 to vector<1x1x1024xi32>
    %7 = arith.cmpi sle, %3, %6 : vector<1x1x1024xi32>
    %cst = arith.constant 0.000000e+00 : f32
    %8 = vector.broadcast %cst : f32 to vector<2x3x1xf32>
    %cst_2 = arith.constant 0.000000e+00 : f32
    %9 = vector.broadcast %cst_2 : f32 to vector<2x3x32xf32>
    %10 = vector.extract_strided_slice %0 {offsets = [0, 0, 0], sizes = [2, 3, 1023], strides = [1, 1, 1]} : vector<2x3x1024xf32> to vector<2x3x1023xf32>
    %11 = tpu.concatenate %8, %10 in 2 : vector<2x3x1xf32>, vector<2x3x1023xf32> -> vector<2x3x1024xf32>
    %cst_3 = arith.constant 0.000000e+00 : f32
    %12 = vector.shape_cast %5 : vector<1x1x1024xi1> to vector<1x1x1024xi1>
    %13 = vector.broadcast %12 : vector<1x1x1024xi1> to vector<2x3x1024xi1>
    %14 = vector.broadcast %cst_3 : f32 to vector<2x3x1024xf32>
    %15 = arith.select %13, %11, %14 : vector<2x3x1024xi1>, vector<2x3x1024xf32>
    %16 = vector.extract_strided_slice %0 {offsets = [0, 0, 1], sizes = [2, 3, 1023], strides = [1, 1, 1]} : vector<2x3x1024xf32> to vector<2x3x1023xf32>
    %17 = tpu.concatenate %16, %8 in 2 : vector<2x3x1023xf32>, vector<2x3x1xf32> -> vector<2x3x1024xf32>
    %cst_4 = arith.constant 0.000000e+00 : f32
    %18 = vector.shape_cast %7 : vector<1x1x1024xi1> to vector<1x1x1024xi1>
    %19 = vector.broadcast %18 : vector<1x1x1024xi1> to vector<2x3x1024xi1>
    %20 = vector.broadcast %cst_4 : f32 to vector<2x3x1024xf32>
    %21 = arith.select %19, %17, %20 : vector<2x3x1024xi1>, vector<2x3x1024xf32>
    %22 = vector.extract_strided_slice %15 {offsets = [0, 0, 0], sizes = [2, 3, 992], strides = [1, 1, 1]} : vector<2x3x1024xf32> to vector<2x3x992xf32>
    %23 = tpu.concatenate %9, %22 in 2 : vector<2x3x32xf32>, vector<2x3x992xf32> -> vector<2x3x1024xf32>
    %24 = vector.extract_strided_slice %0 {offsets = [0, 0, 0], sizes = [2, 3, 992], strides = [1, 1, 1]} : vector<2x3x1024xf32> to vector<2x3x992xf32>
    %25 = tpu.concatenate %9, %24 in 2 : vector<2x3x32xf32>, vector<2x3x992xf32> -> vector<2x3x1024xf32>
    %26 = vector.extract_strided_slice %21 {offsets = [0, 0, 0], sizes = [2, 3, 992], strides = [1, 1, 1]} : vector<2x3x1024xf32> to vector<2x3x992xf32>
    %27 = tpu.concatenate %9, %26 in 2 : vector<2x3x32xf32>, vector<2x3x992xf32> -> vector<2x3x1024xf32>
    %28 = vector.extract_strided_slice %15 {offsets = [0, 0, 32], sizes = [2, 3, 992], strides = [1, 1, 1]} : vector<2x3x1024xf32> to vector<2x3x992xf32>
    %29 = tpu.concatenate %28, %9 in 2 : vector<2x3x992xf32>, vector<2x3x32xf32> -> vector<2x3x1024xf32>
    %30 = vector.extract_strided_slice %0 {offsets = [0, 0, 32], sizes = [2, 3, 992], strides = [1, 1, 1]} : vector<2x3x1024xf32> to vector<2x3x992xf32>
    %31 = tpu.concatenate %30, %9 in 2 : vector<2x3x992xf32>, vector<2x3x32xf32> -> vector<2x3x1024xf32>
    %32 = vector.extract_strided_slice %21 {offsets = [0, 0, 32], sizes = [2, 3, 992], strides = [1, 1, 1]} : vector<2x3x1024xf32> to vector<2x3x992xf32>
    %33 = tpu.concatenate %32, %9 in 2 : vector<2x3x992xf32>, vector<2x3x32xf32> -> vector<2x3x1024xf32>
    %34 = tpu.concatenate %23, %25, %27, %15, %0, %21, %29, %31, %33 in 1 : vector<2x3x1024xf32>, vector<2x3x1024xf32>, vector<2x3x1024xf32>, vector<2x3x1024xf32>, vector<2x3x1024xf32>, vector<2x3x1024xf32>, vector<2x3x1024xf32>, vector<2x3x1024xf32>, vector<2x3x1024xf32> -> vector<2x27x1024xf32>
    %c0_5 = arith.constant 0 : index
    %c0_6 = arith.constant 0 : index
    %35 = vector.load %arg2[%c0_5, %c0_6] : memref<8x27xf32, #tpu.memory_space<vmem>>, vector<8x27xf32>
    %36 = vector.shape_cast %35 : vector<8x27xf32> to vector<1x8x27xf32>
    %37 = vector.shape_cast %36 : vector<1x8x27xf32> to vector<1x8x27xf32>
    %38 = vector.broadcast %37 : vector<1x8x27xf32> to vector<2x8x27xf32>
    %cst_7 = arith.constant dense<0.000000e+00> : vector<2x8x1024xf32>
    %39 = tpu.matmul %38, %34, %cst_7 {dimension_numbers = #tpu.dot_dimension_numbers<[2], [1], [1], [2], [0, 0, 0, 1, 1, 2], [0], [0]>} : vector<2x8x27xf32>, vector<2x27x1024xf32>, vector<2x8x1024xf32> -> vector<2x8x1024xf32>
    %cst_8 = arith.constant 0.000000e+00 : f32
    %40 = vector.broadcast %cst_8 : f32 to vector<2x8x1024xf32>
    %41 = arith.maximumf %39, %40 : vector<2x8x1024xf32>
    %42 = vector.extract_strided_slice %41 {offsets = [0, 0, 0], sizes = [2, 1, 1024], strides = [1, 1, 1]} : vector<2x8x1024xf32> to vector<2x1x1024xf32>
    %43 = vector.shape_cast %42 : vector<2x1x1024xf32> to vector<2x1024xf32>
    %44 = vector.extract_strided_slice %41 {offsets = [0, 1, 0], sizes = [2, 1, 1024], strides = [1, 1, 1]} : vector<2x8x1024xf32> to vector<2x1x1024xf32>
    %45 = vector.shape_cast %44 : vector<2x1x1024xf32> to vector<2x1024xf32>
    %46 = vector.extract_strided_slice %41 {offsets = [0, 2, 0], sizes = [2, 1, 1024], strides = [1, 1, 1]} : vector<2x8x1024xf32> to vector<2x1x1024xf32>
    %47 = vector.shape_cast %46 : vector<2x1x1024xf32> to vector<2x1024xf32>
    %48 = vector.extract_strided_slice %41 {offsets = [0, 3, 0], sizes = [2, 1, 1024], strides = [1, 1, 1]} : vector<2x8x1024xf32> to vector<2x1x1024xf32>
    %49 = vector.shape_cast %48 : vector<2x1x1024xf32> to vector<2x1024xf32>
    %50 = vector.extract_strided_slice %41 {offsets = [0, 4, 0], sizes = [2, 1, 1024], strides = [1, 1, 1]} : vector<2x8x1024xf32> to vector<2x1x1024xf32>
    %51 = vector.shape_cast %50 : vector<2x1x1024xf32> to vector<2x1024xf32>
    %52 = vector.extract_strided_slice %41 {offsets = [0, 5, 0], sizes = [2, 1, 1024], strides = [1, 1, 1]} : vector<2x8x1024xf32> to vector<2x1x1024xf32>
    %53 = vector.shape_cast %52 : vector<2x1x1024xf32> to vector<2x1024xf32>
    %54 = vector.extract_strided_slice %41 {offsets = [0, 6, 0], sizes = [2, 1, 1024], strides = [1, 1, 1]} : vector<2x8x1024xf32> to vector<2x1x1024xf32>
    %55 = vector.shape_cast %54 : vector<2x1x1024xf32> to vector<2x1024xf32>
    %56 = vector.extract_strided_slice %41 {offsets = [0, 7, 0], sizes = [2, 1, 1024], strides = [1, 1, 1]} : vector<2x8x1024xf32> to vector<2x1x1024xf32>
    %57 = vector.shape_cast %56 : vector<2x1x1024xf32> to vector<2x1024xf32>
    %58 = tpu.concatenate %43, %45, %47, %49, %51, %53, %55, %57 in 1 : vector<2x1024xf32>, vector<2x1024xf32>, vector<2x1024xf32>, vector<2x1024xf32>, vector<2x1024xf32>, vector<2x1024xf32>, vector<2x1024xf32>, vector<2x1024xf32> -> vector<2x8192xf32>
    %c0_9 = arith.constant 0 : index
    %c0_10 = arith.constant 0 : index
    %59 = vector.load %arg3[%c0_9, %c0_10] : memref<10x8192xf32, #tpu.memory_space<vmem>>, vector<10x8192xf32>
    %cst_11 = arith.constant dense<0.000000e+00> : vector<2x10xf32>
    %60 = tpu.matmul %58, %59, %cst_11 {dimension_numbers = #tpu.dot_dimension_numbers<[1], [1], [0], [0], [0, 0, 1, 0], [], []>} : vector<2x8192xf32>, vector<10x8192xf32>, vector<2x10xf32> -> vector<2x10xf32>
    %c0_12 = arith.constant 0 : index
    %c0_13 = arith.constant 0 : index
    %61 = vector.load %arg4[%c0_12, %c0_13] : memref<1x10xf32, #tpu.memory_space<vmem>>, vector<1x10xf32>
    %62 = vector.broadcast %61 : vector<1x10xf32> to vector<2x10xf32>
    %63 = arith.addf %60, %62 : vector<2x10xf32>
    %c0_14 = arith.constant 0 : index
    %c0_15 = arith.constant 0 : index
    %64 = vector.load %arg5[%c0_14, %c0_15] : memref<2x10xf32, #tpu.memory_space<vmem>>, vector<2x10xf32>
    tpu.vector_store %arg5[%c0_14, %c0_15], %63 {strides = array<i32>} : memref<2x10xf32, #tpu.memory_space<vmem>>, vector<2x10xf32>,
    return
  }
  func.func @transform_0(%arg0: i32) -> (i32, i32, i32) {
    %c0_i32 = arith.constant 0 : i32
    %c0_i32_0 = arith.constant 0 : i32
    %c0_i32_1 = arith.constant 0 : i32
    return %arg0, %c0_i32, %c0_i32_0 : i32, i32, i32
  }
  func.func @transform_1(%arg0: i32) -> (i32, i32) {
    %c0_i32 = arith.constant 0 : i32
    %c0_i32_0 = arith.constant 0 : i32
    %c0_i32_1 = arith.constant 0 : i32
    return %c0_i32, %c0_i32_0 : i32, i32
  }
  func.func @transform_2(%arg0: i32) -> (i32, i32) {
    %c0_i32 = arith.constant 0 : i32
    %c0_i32_0 = arith.constant 0 : i32
    %c0_i32_1 = arith.constant 0 : i32
    return %c0_i32, %c0_i32_0 : i32, i32
  }
  func.func @transform_3(%arg0: i32) -> (i32, i32) {
    %c0_i32 = arith.constant 0 : i32
    %c0_i32_0 = arith.constant 0 : i32
    %c0_i32_1 = arith.constant 0 : i32
    return %c0_i32, %c0_i32_0 : i32, i32
  }
  func.func @transform_4(%arg0: i32) -> (i32, i32) {
    %c0_i32 = arith.constant 0 : i32
    %c0_i32_0 = arith.constant 0 : i32
    return %arg0, %c0_i32 : i32, i32
  }
}

</mosaic_0001>

<bundles_post_ra>
// kernel: elm_forward.1
= control target key start
LH: loop header
LB: loop body
LE: loop exit
PB: predicated region body
PF: predicated region fallthrough
CT: control target
= control target key end

     0   :  { %9 = vsyncpa [#allocation3], 0  ;;  %s7033_s0 = inlined_call_operand.vmem [shape: f32[2,3,1024], index: 0, kind: input, shape index: {}]   ;;  %s7034_s1 = inlined_call_operand.vmem [shape: f32[8,27], index: 1, kind: input, shape index: {}]   ;;  %s7035_s2 = inlined_call_operand.hbm [shape: f32[10,8192], index: 2, kind: input, shape index: {}]   ;;  %s7036_s3 = inlined_call_operand.vmem [shape: f32[1,10], index: 3, kind: input, shape index: {}]   ;;  %s7037_s4 = inlined_call_operand.hbm [shape: f32[2,10], index: 4, kind: output, shape index: {}]  }
   0x1   :  { %10 = vsyncpa [#allocation4], 0  ;;  %s4928_s15 = smov [#allocation2]   ;;  %s4880_s19 = scalar_lea.hbm %s7035_s2, 16384 }
   0x2   :  { %s20_s16 = sshll.u32 %s4928_s15, 4  ;;  %p4881_p0 = scmp.ne.s32.totalorder %s7035_s2, %s4880_s19  ;;  %s21_s16 = int_to_ptr.vmem [resolvable:$true] %s20_s16 }
   0x3   :  { %p4884_p1 = scmp.lt.u32.totalorder %s4880_s19, %s7035_s2 }
   0x5   :  { %p4886_p2 = pnand %p4884_p1, %p4881_p0 }
   0x7   :  { %4889 = shalt.err (!%p4886_p2)
}
   0x8   :  { %s4890_s24 = scalar_lea.vmem %s21_s16, 16384  ;;  %p4895_p4 = scmp.lt.s32.totalorder %s21_s16, %s21_s16 }
   0x9   :  { %p4891_p3 = scmp.ne.s32.totalorder %s21_s16, %s4890_s24  ;;  %p4896_p5 = scmp.lt.s32.totalorder %s4890_s24, %s4890_s24 }
   0xb   :  { %p4897_p6 = por %p4896_p5, %p4895_p4 }
   0xd   :  { %p4898_p7 = pnand %p4897_p6, %p4891_p3 }
   0xf   :  { %4901 = shalt.err (!%p4898_p7)
}
  0x10   :  { %s4929_s25 = smov 8192   ;;  %s4930_s26 = smov 512  }
  0x11   :  { %26 = dma.hbm_to_vmem [thread:$0]  %s7035_s2, 16384, %s21_s16, [#allocation3], %s4929_s25, %s4929_s25, %s4930_s26  }
  0x12   :  { %4924 = dma.done.wait [#allocation3], 16384  }
  0x13   :  { %4925 = vsyncadd [#allocation3], 4294950912  ;;  %v4978_v0 = vld [vmem:[%s7033_s0] sm:$0x77]  ;;  %v4983_v1 = vld [vmem:[%s7033_s0 + $0x8] sm:$0x77]  ;;  %v40_v26 = vlaneseq }
  0x14   :  { %v4987_v2 = vcombine.high %v4978_v0, %v4978_v0  ;;  %v4991_v3 = vcombine.high %v4983_v1, %v4983_v1  ;;  %v4996_v4 = vld [vmem:[%s7033_s0 + $0x10] sm:$0x77]  ;;  %s4931_s8 = smov 1   ;;  %s4932_s9 = smov 127   ;;  %v5011_v8 = vld [vmem:[%s7033_s0 + $0x18] sm:$0x77]  ;;  %v4628_v24 = vpack.i.bf16 %v4978_v0, %v4983_v1 }
  0x15   :  { %v5006_v7 = vcombine.high %v4996_v4, %v4996_v4  ;;  %7090 = vst [vmem:[#allocation8_spill] sm:$0xff] %v5011_v8  ;;  %v5019_v10 = vcombine.high %v5011_v8, %v5011_v8  ;;  %v5024_v11 = vld [vmem:[%s7033_s0 + $0x28] sm:$0x77]  ;;  %v5029_v12 = vld [vmem:[%s7033_s0 + $0x20] sm:$0x77]  ;;  %s4933_s20 = smov 32  }
  0x16   :  { %v4553_v5 = vpack.i.bf16 %v4987_v2, %v4978_v0  ;;  %v4558_v6 = vpack.i.bf16 %v4991_v3, %v4983_v1  ;;  %7091 = vst [vmem:[#allocation9_spill] sm:$0xff] %v5024_v11  ;;  %7092 = vst [vmem:[#allocation10_spill] sm:$0xff] %v5029_v12  ;;  %v5033_v13 = vcombine.high %v5024_v11, %v5024_v11  ;;  %v5052_v18 = vld [vmem:[%s7033_s0 + $0x30] sm:$0x77]  ;;  %v5063_v20 = vld [vmem:[%s7033_s0 + $0x38] sm:$0x77] }
  0x17   :  { %v4568_v9 = vpack.i.bf16 %v5006_v7, %v4996_v4  ;;  %v4578_v14 = vpack.i.bf16 %v5019_v10, %v5011_v8  ;;  %v5041_v15 = vcombine.high %v5029_v12, %v5029_v12  ;;  %7093 = vst [vmem:[#allocation11_spill] sm:$0xff] %v5052_v18  ;;  %v5058_v19 = vcombine.high %v5052_v18, %v5052_v18  ;;  %s4934_s21 = smov 96  }
  0x18   :  { %4554 = vrot.lane.b32.xlu1 %v4553_v5, %s4931_s8  ;;  %4544 = vrot.lane.b32.xlu0 %v4553_v5, %s4932_s9  ;;  %v4588_v16 = vpack.i.bf16 %v5033_v13, %v5024_v11  ;;  %7094 = vst [vmem:[#allocation12_spill] sm:$0xff] %v5063_v20  ;;  %v5071_v22 = vcombine.high %v5063_v20, %v5063_v20  ;;  %v5096_v27 = vand.u32 127, %v40_v26  ;;  %vm121_vm0 = vcmask 7168  }
  0x19   :  { %v4583_v17 = vpack.i.bf16 %v5041_v15, %v5029_v12  ;;  %v4608_v21 = vpack.i.bf16 %v5058_v19, %v5052_v18  ;;  %v4653_v25 = vpack.i.bf16 %v5029_v12, %v5024_v11  ;;  %vm218_vm4 = vcmask 1039360  }
  0x1a   :  { %v5077_v23 = vpack.i.bf16 %v5071_v22, %v5063_v20  ;;  %v5099_v28 = vadd.s32 128, %v5096_v27  ;;  %v5102_v29 = vadd.s32 256, %v5096_v27  ;;  %v49_v30 = vand.u32 31, %v5096_v27 }
  0x1b   :  { %v5106_v31 = vadd.s32 384, %v5096_v27  ;;  %v45_v46 = vadd.s32 512, %v5096_v27 }
  0x1c   :  { %4559 = vrot.lane.b32.xlu1 %v4558_v6, %s4931_s8  ;;  %4549 = vrot.lane.b32.xlu0 %v4558_v6, %s4932_s9  ;;  %v50_v34 = vand.u32 31, %v5099_v28  ;;  %vm5111_vm1 = vcmp.ge.s32.totalorder %v49_v30, 1  ;;  %v51_v38 = vand.u32 31, %v5102_v29  ;;  %vm5161_vm6 = vcmp.le.s32.totalorder %v49_v30, 30 }
  0x1d   :  { %v52_v40 = vand.u32 31, %v5106_v31  ;;  %v53_v60 = vand.u32 31, %v45_v46 }
  0x1e   :  { %vm5127_vm2 = vcmp.ge.s32.totalorder %v50_v34, 1  ;;  %vm5134_vm3 = vcmp.ge.s32.totalorder %v51_v38, 1  ;;  %vm5238_vm12 = vcmp.le.s32.totalorder %v50_v34, 30 }
  0x1f   :  { %vm5157_vm5 = vcmp.ge.s32.totalorder %v52_v40, 1  ;;  %vm5168_vm7 = vcmp.ge.s32.totalorder %v53_v60, 1  ;;  %vm5204_vm9 = vcmp.le.s32.totalorder %v53_v60, 30  ;;  %vm5290_vm15 = vcmp.le.s32.totalorder %v52_v40, 30 }
  0x20   :  { %4569 = vrot.lane.b32.xlu1 %v4568_v9, %s4931_s8  ;;  %4564 = vrot.lane.b32.xlu0 %v4568_v9, %s4932_s9 }
  0x24   :  { %4579 = vrot.lane.b32.xlu1 %v4578_v14, %s4931_s8  ;;  %4574 = vrot.lane.b32.xlu0 %v4578_v14, %s4932_s9 }
  0x28   :  { %4589 = vrot.lane.b32.xlu1 %v4588_v16, %s4932_s9  ;;  %4584 = vrot.lane.b32.xlu0 %v4583_v17, %s4932_s9 }
  0x2c   :  { %4599 = vrot.lane.b32.xlu1 %v4588_v16, %s4931_s8  ;;  %4594 = vrot.lane.b32.xlu0 %v4583_v17, %s4931_s8 }
  0x30   :  { %4609 = vrot.lane.b32.xlu1 %v4608_v21, %s4931_s8  ;;  %4604 = vrot.lane.b32.xlu0 %v4608_v21, %s4932_s9 }
  0x34   :  { %4614 = vrot.lane.b32.xlu0 %v5077_v23, %s4932_s9  ;;  %4619 = vrot.lane.b32.xlu1 %v5077_v23, %s4931_s8  ;;  %s4937_s9 = smov [#allocation5]  }
  0x35   :  { %s4229_s10 = sshll.u32 %s4937_s9, 4  ;;  %s4230_s10 = int_to_ptr.vmem [resolvable:$true] %s4229_s10 }
  0x36   :  { %s4902_s11 = scalar_lea.vmem %s4230_s10, 32  ;;  %p4907_p9 = scmp.lt.s32.totalorder %s4230_s10, %s4230_s10 }
  0x37   :  { %p4903_p8 = scmp.ne.s32.totalorder %s4230_s10, %s4902_s11  ;;  %p4908_p10 = scmp.lt.s32.totalorder %s4902_s11, %s4902_s11 }
  0x38   :  { %4624 = vrot.lane.b32.xlu1 %v4553_v5, %s4933_s20  ;;  %4639 = vrot.lane.b32.xlu0 %v4568_v9, %s4933_s20 }
  0x39   :  { %p4909_p11 = por %p4908_p10, %p4907_p9 }
  0x3b   :  { %p4910_p12 = pnand %p4909_p11, %p4903_p8 }
  0x3c   :  { %4629 = vrot.lane.b32.xlu1 %v4628_v24, %s4934_s21  ;;  %4644 = vrot.lane.b32.xlu0 %v4578_v14, %s4933_s20 }
  0x40   :  { %4634 = vrot.lane.b32.xlu1 %v4558_v6, %s4933_s20  ;;  %4664 = vrot.lane.b32.xlu0 %v4608_v21, %s4933_s20  ;;  %v46_v6 = vadd.s32 640, %v5096_v27 }
  0x44   :  { %4649 = vrot.lane.b32.xlu1 %v4583_v17, %s4933_s20 }
  0x48   :  { %4654 = vrot.lane.b32.xlu1 %v4653_v25, %s4934_s21 }
  0x4c   :  { %4659 = vrot.lane.b32.xlu1 %v4588_v16, %s4933_s20 }
  0x8a   :  { %v4555_v32 = vpop.permute.xlu1 %4554  ;;  %v5108_v33 = vpop.permute.xlu0 %4544 }
  0x8b   :  { %v4557_v36 = vunpack.i.h.bf16 %v4555_v32  ;;  %v4556_v37 = vunpack.i.l.bf16 %v4555_v32  ;;  %v4547_v50 = vunpack.i.h.bf16 %v5108_v33  ;;  %v4546_v51 = vunpack.i.l.bf16 %v5108_v33 }
  0x8c   :  { %v54_v32 = vand.u32 31, %v46_v6  ;;  %v47_v33 = vadd.s32 768, %v5096_v27 }
  0x8d   :  { %v152_v39 = vsel %vm121_vm0, 0.0, %v4556_v37  ;;  %v122_v41 = vsel %vm121_vm0, %v4556_v37, %v4557_v36  ;;  %v219_v63 = vsel %vm218_vm4, %v4546_v51, %v4547_v50 }
  0x8e   :  { %v5121_v42 = vsel %vm5111_vm1, %v152_v39, 0.0  ;;  %v4560_v43 = vpop.permute.xlu1 %4559  ;;  %v5123_v44 = vpop.permute.xlu0 %4549  ;;  %v5145_v54 = vsel %vm5127_vm2, %v122_v41, 0.0  ;;  %v5181_v21 = vsel %vm5161_vm6, %v219_v63, 0.0  ;;  %vm5198_vm8 = vcmp.le.s32.totalorder %v54_v32, 30 }
  0x8f   :  { %v4562_v47 = vunpack.i.h.bf16 %v4560_v43  ;;  %v4561_v48 = vunpack.i.l.bf16 %v4560_v43  ;;  %v4668_v52 = vpack.i.bf16 %v4987_v2, %v5121_v42  ;;  %vm5215_vm10 = vcmp.ge.s32.totalorder %v54_v32, 1 }
  0x91   :  { %v123_v53 = vsel %vm121_vm0, %v4557_v36, %v4561_v48  ;;  %v124_v55 = vsel %vm121_vm0, %v4561_v48, %v4562_v47  ;;  %4669 = vrot.lane.b32.xlu0 %v4668_v52, %s4934_s21  ;;  %v48_v48 = vadd.s32 896, %v5096_v27  ;;  %v4551_v52 = vunpack.i.l.bf16 %v5123_v44 }
  0x92   :  { %v4570_v56 = vpop.permute.xlu1 %4569  ;;  %v5148_v57 = vpop.permute.xlu0 %4564  ;;  %v5152_v58 = vsel %vm5134_vm3, %v123_v53, 0.0  ;;  %v5176_v14 = vsel %vm5157_vm5, %v124_v55, 0.0  ;;  %v55_v27 = vand.u32 31, %v47_v33 }
  0x93   :  { %v4571_v61 = vunpack.i.l.bf16 %v4570_v56  ;;  %v4688_v2 = vpack.i.bf16 %v5152_v58, %v5145_v54  ;;  %v4567_v25 = vunpack.i.h.bf16 %v5148_v57  ;;  %v4566_v26 = vunpack.i.l.bf16 %v5148_v57 }
  0x94   :  { %v4703_v30 = vpack.i.bf16 %v5176_v14, %v5181_v21  ;;  %v4572_v36 = vunpack.i.h.bf16 %v4570_v56  ;;  %v56_v6 = vand.u32 31, %v48_v48  ;;  %vm5226_vm11 = vcmp.ge.s32.totalorder %v55_v27, 1 }
  0x95   :  { %v125_v9 = vsel %vm121_vm0, %v4562_v47, %v4571_v61  ;;  %4689 = vrot.lane.b32.xlu1 %v4688_v2, %s4934_s21  ;;  %v223_v47 = vsel %vm218_vm4, %v4566_v26, %v4567_v25  ;;  %vm5266_vm14 = vcmp.le.s32.totalorder %v55_v27, 30  ;;  %v4708_v45 = vpack.i.bf16 %v5176_v14, %v5152_v58 }
  0x96   :  { %v4575_v16 = vpop.permute.xlu0 %4574  ;;  %v5185_v24 = vsel %vm5168_vm7, %v125_v9, 0.0  ;;  %v4580_v46 = vpop.permute.xlu1 %4579  ;;  %v5221_v63 = vsel %vm5204_vm9, %v223_v47, 0.0  ;;  %vm5261_vm13 = vcmp.le.s32.totalorder %v56_v6, 30 }
  0x97   :  { %v4576_v17 = vunpack.i.l.bf16 %v4575_v16  ;;  %v4713_v41 = vpack.i.bf16 %v4991_v3, %v5185_v24  ;;  %v126_v3 = vsel %vm121_vm0, %v4571_v61, %v4572_v36  ;;  %v4581_v55 = vunpack.i.l.bf16 %v4580_v46 }
  0x98   :  { %v5234_v32 = vsel %vm5215_vm10, %v126_v3, 0.0 }
  0x99   :  { %v224_v37 = vsel %vm218_vm4, %v4567_v25, %v4576_v17  ;;  %4704 = vrot.lane.b32.xlu1 %v4703_v30, %s4934_s21  ;;  %v127_v2 = vsel %vm121_vm0, %v4572_v36, %v4581_v55  ;;  %v220_v25 = vsel %vm218_vm4, %v4547_v50, %v4551_v52  ;;  %v4577_v36 = vunpack.i.h.bf16 %v4575_v16 }
  0x9a   :  { %v5194_v39 = vpop.permute.xlu0 %4584  ;;  %v5211_v53 = vsel %vm5198_vm8, %v224_v37, 0.0  ;;  %v5253_v47 = vpop.permute.xlu1 %4589  ;;  %v4728_v28 = vpack.i.bf16 %v5234_v32, %v5221_v63  ;;  %v5259_v34 = vsel %vm5238_vm12, %v220_v25, 0.0  ;;  %v4582_v16 = vunpack.i.h.bf16 %v4580_v46 }
  0x9b   :  { %v4723_v61 = vpack.i.bf16 %v5211_v53, %v5221_v63  ;;  %v249_v48 = vsel %vm218_vm4, %v4577_v36, 0.0  ;;  %v225_v3 = vsel %vm218_vm4, %v4576_v17, %v4577_v36  ;;  %v4678_v25 = vpack.i.bf16 %v5259_v34, %v5181_v21 }
  0x9c   :  { %v5286_v17 = vsel %vm5266_vm14, %v225_v3, 0.0  ;;  %v4733_v5 = vpack.i.bf16 %v5234_v32, %v5185_v24  ;;  %v4743_v51 = vpack.i.bf16 %v5211_v53, %v5011_v8 }
  0x9d   :  { %4714 = vrot.lane.b32.xlu1 %v4713_v41, %s4934_s21  ;;  %v5251_v41 = vsel %vm5226_vm11, %v127_v2, 0.0 }
  0x9e   :  { %v4595_v56 = vpop.permute.xlu0 %4594  ;;  %v4738_v2 = vpack.i.bf16 %v5006_v7, %v5251_v41  ;;  %v4600_v46 = vpop.permute.xlu1 %4599 }
  0x9f   :  { %v4596_v60 = vunpack.i.l.bf16 %v4595_v56 }
  0xa1   :  { %v153_v30 = vsel %vm121_vm0, 0.0, %v4596_v60  ;;  %4724 = vrot.lane.b32.xlu1 %v4723_v61, %s4933_s20  ;;  %v4552_v61 = vunpack.i.h.bf16 %v5123_v44  ;;  %v128_v44 = vsel %vm121_vm0, %v4581_v55, %v4582_v16 }
  0xa2   :  { %v5244_v37 = vsel %vm5111_vm1, %v153_v30, 0.0  ;;  %v5281_v30 = vsel %vm5261_vm13, %v249_v48, 0.0  ;;  %vm5296_vm1 = vcmp.ge.s32.totalorder %v56_v6, 1  ;;  %v4601_v6 = vunpack.i.l.bf16 %v4600_v46  ;;  %v5327_v16 = vpop.permute.xlu0 %4604 }
  0xa3   :  { %7117 = vst [vmem:[#allocation13_spill] sm:$0xff] %v5244_v37  ;;  %v4673_v50 = vpack.i.bf16 %v5041_v15, %v5244_v37  ;;  %v7120_v15 = vmov 0  ;;  %v222_v27 = vsel %vm218_vm4, %v4552_v61, %v4566_v26  ;;  %v221_v36 = vsel %vm218_vm4, %v4551_v52, %v4552_v61 }
  0xa4   :  { %v7121_v15 = vsel %vm5266_vm14, 4294967295, %v7120_v15  ;;  %vm5305_vm14 = vcmp.le.s32.totalorder %v51_v38, 30  ;;  %v4748_v40 = vpack.i.bf16 %v5281_v30, %v5286_v17  ;;  %v5313_v55 = vsel %vm5290_vm15, %v222_v27, 0.0 }
  0xa5   :  { %4674 = vrot.lane.b32.xlu0 %v4673_v50, %s4934_s21  ;;  %4729 = vrot.lane.b32.xlu1 %v4728_v28, %s4934_s21  ;;  %v4683_v50 = vpack.i.bf16 %v5145_v54, %v5121_v42  ;;  %v4597_v28 = vunpack.i.h.bf16 %v4595_v56  ;;  %v5318_v52 = vsel %vm5296_vm1, %v128_v44, 0.0  ;;  %v5323_v29 = vsel %vm5305_vm14, %v221_v36, 0.0 }
  0xa6   :  { %v4693_v38 = vpack.i.bf16 %v5313_v55, %v5323_v29  ;;  %v4753_v56 = vpack.i.bf16 %v5318_v52, %v5286_v17  ;;  %v4602_v61 = vunpack.i.h.bf16 %v4600_v46  ;;  %v4586_v27 = vunpack.i.l.bf16 %v5194_v39 }
  0xa7   :  { %v130_v48 = vsel %vm121_vm0, %v4597_v28, %v4601_v6  ;;  %v129_v3 = vsel %vm121_vm0, %v4596_v60, %v4597_v28  ;;  %v4698_v44 = vpack.i.bf16 %v5323_v29, %v5259_v34  ;;  %v4763_v36 = vpack.i.bf16 %v5281_v30, %v5019_v10 }
  0xa8   :  { %v5347_v60 = vsel %vm5134_vm3, %v130_v48, 0.0  ;;  %v4758_v57 = vpack.i.bf16 %v5318_v52, %v5251_v41  ;;  %vm512_vm3 = vcmask 785408  }
  0xa9   :  { %4679 = vrot.lane.b32.xlu0 %v4678_v25, %s4933_s20  ;;  %4739 = vrot.lane.b32.xlu1 %v4738_v2, %s4934_s21  ;;  %v4610_v2 = vpop.permute.xlu1 %4609  ;;  %v4587_v25 = vunpack.i.h.bf16 %v5194_v39  ;;  %7129 = vst [vmem:[#allocation15_spill] sm:$0xff] %v5347_v60  ;;  %v131_v39 = vsel %vm121_vm0, %v4601_v6, %v4602_v61 }
  0xaa   :  { %v4611_v46 = vunpack.i.l.bf16 %v4610_v2  ;;  %v5363_v6 = vsel %vm5157_vm5, %v131_v39, 0.0  ;;  %vm932_vm5 = vcmask 1041408  }
  0xab   :  { %v226_v28 = vsel %vm218_vm4, %v4586_v27, %v4587_v25  ;;  %7130 = vst [vmem:[#allocation16_spill] sm:$0xff] %v5363_v6  ;;  %v4798_v26 = vpack.i.bf16 %v5363_v6, %v5347_v60 }
  0xac   :  { %v132_v49 = vsel %vm121_vm0, %v4602_v61, %v4611_v46  ;;  %v4718_v61 = vpack.i.bf16 %v5313_v55, %v4996_v4 }
  0xad   :  { %4684 = vrot.lane.b32.xlu0 %v4683_v50, %s4933_s20  ;;  %4749 = vrot.lane.b32.xlu1 %v4748_v40, %s4933_s20  ;;  %v5343_v50 = vsel %vm5127_vm2, %v129_v3, 0.0  ;;  %v4615_v40 = vpop.permute.xlu0 %4614  ;;  %v5368_v3 = vsel %vm5161_vm6, %v226_v28, 0.0  ;;  %v5374_v27 = vsel %vm5168_vm7, %v132_v49, 0.0  ;;  %v4620_v62 = vpop.permute.xlu1 %4619  ;;  %v4591_v49 = vunpack.i.l.bf16 %v5253_v47 }
  0xae   :  { %7128 = vst [vmem:[#allocation14_spill] sm:$0xff] %v5343_v50  ;;  %v4778_v10 = vpack.i.bf16 %v5347_v60, %v5343_v50  ;;  %v4616_v48 = vunpack.i.l.bf16 %v4615_v40  ;;  %7131 = vst [vmem:[#allocation17_spill] sm:$0xff] %v5368_v3  ;;  %v4793_v59 = vpack.i.bf16 %v5363_v6, %v5368_v3  ;;  %v4803_v39 = vpack.i.bf16 %v5033_v13, %v5374_v27 }
  0xaf   :  { %7132 = vst [vmem:[#allocation18_spill] sm:$0xff] %v5374_v27  ;;  %vm7139_vm2 = vnez %v7121_v15  ;;  %v4773_v35 = vpack.i.bf16 %v5343_v50, %v5244_v37  ;;  %vm949_vm6 = vcmask 1044480   ;;  %vm898_vm7 = vcmask 1043456  }
  0xb1   :  { %4694 = vrot.lane.b32.xlu0 %v4693_v38, %s4933_s20  ;;  %4754 = vrot.lane.b32.xlu1 %v4753_v56, %s4934_s21  ;;  %v4607_v38 = vunpack.i.h.bf16 %v5327_v16  ;;  %v4606_v56 = vunpack.i.l.bf16 %v5327_v16  ;;  %v4612_v16 = vunpack.i.h.bf16 %v4610_v2 }
  0xb5   :  { %4699 = vrot.lane.b32.xlu0 %v4698_v44, %s4934_s21  ;;  %4764 = vrot.lane.b32.xlu1 %v4763_v36, %s4934_s21  ;;  %v230_v44 = vsel %vm218_vm4, %v4606_v56, %v4607_v38  ;;  %v231_v36 = vsel %vm218_vm4, %v4607_v38, %v4616_v48  ;;  %v4617_v38 = vunpack.i.h.bf16 %v4615_v40 }
  0xb6   :  { %v5388_v2 = vsel %vm5204_vm9, %v230_v44, 0.0  ;;  %v5392_v28 = vsel %vm5198_vm8, %v231_v36, 0.0  ;;  %v227_v44 = vsel %vm218_vm4, %v4587_v25, %v4591_v49  ;;  %vm915_vm8 = vcmask 1046528  }
  0xb7   :  { %7133 = vst [vmem:[#allocation19_spill] sm:$0xff] %v5388_v2  ;;  %7134 = vst [vmem:[#allocation20_spill] sm:$0xff] %v5392_v28  ;;  %v4813_v13 = vpack.i.bf16 %v5392_v28, %v5388_v2  ;;  %v232_v36 = vsel %vm218_vm4, %v4616_v48, %v4617_v38  ;;  %v5423_v25 = vsel %vm5238_vm12, %v227_v44, 0.0  ;;  %vm847_vm9 = vcmask 1042432  }
  0xb8   :  { %7137 = vst [vmem:[#allocation23_spill] sm:$0xff] %v5423_v25  ;;  %v4768_v48 = vpack.i.bf16 %v5423_v25, %v5368_v3  ;;  %v5438_v33 = vsel %vm7139_vm2, %v232_v36, 0.0  ;;  %v5501_v36 = vpop.permute.xlu0 %4639  ;;  %vm4936_vm12 = vmmov 1  }
  0xb9   :  { %4709 = vrot.lane.b32.xlu0 %v4708_v45, %s4933_s20  ;;  %4779 = vrot.lane.b32.xlu1 %v4778_v10, %s4934_s21  ;;  %v133_v10 = vsel %vm121_vm0, %v4611_v46, %v4612_v16  ;;  %v4621_v45 = vunpack.i.l.bf16 %v4620_v62  ;;  %7140 = vst [vmem:[#allocation25_spill] sm:$0xff] %v5438_v33 }
  0xba   :  { %v5404_v43 = vsel %vm5215_vm10, %v133_v10, 0.0  ;;  %v4622_v10 = vunpack.i.h.bf16 %v4620_v62  ;;  %vm864_vm10 = vcmask 1045504  }
  0xbb   :  { %7135 = vst [vmem:[#allocation21_spill] sm:$0xff] %v5404_v43  ;;  %v134_v46 = vsel %vm121_vm0, %v4612_v16, %v4621_v45  ;;  %v250_v16 = vsel %vm218_vm4, %v4617_v38, 0.0  ;;  %v5482_v38 = vpop.permute.xlu1 %4624 }
  0xbc   :  { %v5417_v40 = vsel %vm5226_vm11, %v134_v46, 0.0  ;;  %v5432_v9 = vsel %vm5261_vm13, %v250_v16, 0.0  ;;  %v4833_v46 = vpack.i.bf16 %v5392_v28, %v5063_v20  ;;  %vm967_vm11 = vcmask 220160   ;;  %vm5827_vm13 = vmpackc.low %vm847_vm9, %vm4936_vm12 }
  0xbd   :  { %4719 = vrot.lane.b32.xlu0 %v4718_v61, %s4934_s21  ;;  %4794 = vrot.lane.b32.xlu1 %v4793_v59, %s4934_s21  ;;  %v7039_v61 = vmov 0.0   ;;  %v4818_v59 = vpack.i.bf16 %v5404_v43, %v5388_v2  ;;  %7136 = vst [vmem:[#allocation22_spill] sm:$0xff] %v5417_v40  ;;  %7138 = vst [vmem:[#allocation24_spill] sm:$0xff] %v5432_v9 }
  0xbe   :  { %1052 = vmatprep.mubr.f32.mxu1 %v7039_v61 }
  0xbf   :  { %v5488_v44 = vpop.permute.xlu1 %4629 }
  0xc1   :  { %4734 = vrot.lane.b32.xlu0 %v4733_v5, %s4933_s20  ;;  %4804 = vrot.lane.b32.xlu1 %v4803_v39, %s4934_s21  ;;  %v4828_v39 = vpack.i.bf16 %v5058_v19, %v5417_v40  ;;  %v4592_v5 = vunpack.i.h.bf16 %v5253_v47  ;;  %v4843_v19 = vpack.i.bf16 %v5432_v9, %v5438_v33 }
  0xc3   :  { %v228_v47 = vsel %vm218_vm4, %v4591_v49, %v4592_v5 }
  0xc5   :  { %4744 = vrot.lane.b32.xlu0 %v4743_v51, %s4934_s21  ;;  %4814 = vrot.lane.b32.xlu1 %v4813_v13, %s4933_s20  ;;  %v229_v13 = vsel %vm218_vm4, %v4592_v5, %v4606_v56  ;;  %v135_v51 = vsel %vm121_vm0, %v4621_v45, %v4622_v10  ;;  %v5457_v56 = vsel %vm5305_vm14, %v228_v47, 0.0  ;;  %vm331_vm0 = vcmask 261120  }
  0xc6   :  { %v5451_v15 = vsel %vm5290_vm15, %v229_v13, 0.0  ;;  %7142 = vst [vmem:[#allocation27_spill] sm:$0xff] %v5457_v56  ;;  %v5463_v49 = vsel %vm5296_vm1, %v135_v51, 0.0  ;;  %v4788_v31 = vpack.i.bf16 %v5457_v56, %v5423_v25  ;;  %v4627_v51 = vunpack.i.h.bf16 %v5482_v38 }
  0xc7   :  { %7141 = vst [vmem:[#allocation26_spill] sm:$0xff] %v5451_v15  ;;  %v4783_v62 = vpack.i.bf16 %v5451_v15, %v5457_v56  ;;  %7143 = vst [vmem:[#allocation28_spill] sm:$0xff] %v5463_v49  ;;  %v4853_v7 = vpack.i.bf16 %v5071_v22, %v5463_v49  ;;  %v4808_v45 = vpack.i.bf16 %v5451_v15, %v5052_v18  ;;  %v4642_v47 = vunpack.i.h.bf16 %v5501_v36 }
  0xc8   :  { %v4823_v22 = vpack.i.bf16 %v5404_v43, %v5374_v27  ;;  %v4641_v5 = vunpack.i.l.bf16 %v5501_v36  ;;  %v4632_v36 = vunpack.i.h.bf16 %v5488_v44  ;;  %vm881_vm4 = vcmask 1040384  }
  0xc9   :  { %4759 = vrot.lane.b32.xlu0 %v4758_v57, %s4933_s20  ;;  %4819 = vrot.lane.b32.xlu1 %v4818_v59, %s4934_s21  ;;  %v4848_v59 = vpack.i.bf16 %v5463_v49, %v5417_v40  ;;  %v5494_v57 = vpop.permute.xlu1 %4634  ;;  %v7156_v27 = vrot.slane %v5234_v32, 7  ;;  %vm1606_vm14 = vcmask 1041409   ;;  %vm4221_vm15 = vcmask 74752  }
  0xcd   :  { %4769 = vrot.lane.b32.xlu0 %v4768_v48, %s4933_s20  ;;  %4829 = vrot.lane.b32.xlu1 %v4828_v39, %s4934_s21  ;;  %v5499_v16 = vpop.permute.xlu1 %4649 }
  0xd1   :  { %4774 = vrot.lane.b32.xlu0 %v4773_v35, %s4933_s20  ;;  %4844 = vrot.lane.b32.xlu1 %v4843_v19, %s4933_s20  ;;  %v5503_v39 = vpop.permute.xlu1 %4654 }
  0xd5   :  { %4784 = vrot.lane.b32.xlu0 %v4783_v62, %s4933_s20  ;;  %609 = vrot.lane.b32.xlu1 %v5438_v33, %s4934_s21  ;;  %v5521_v61 = vpop.permute.xlu1 %4659 }
  0xd9   :  { %4789 = vrot.lane.b32.xlu0 %v4788_v31, %s4934_s21  ;;  %4854 = vrot.lane.b32.xlu1 %v4853_v7, %s4934_s21  ;;  %v4636_v31 = vunpack.i.l.bf16 %v5494_v57  ;;  %v4652_v7 = vunpack.i.h.bf16 %v5499_v16 }
  0xdd   :  { %4799 = vrot.lane.b32.xlu0 %v4798_v26, %s4933_s20  ;;  %v4645_v26 = vpop.permute.xlu0 %4644 }
  0xde   :  { %v4646_v10 = vunpack.i.l.bf16 %v4645_v26 }
  0xe0   :  { %v5592_v56 = vsel %vm331_vm0, %v4642_v47, %v4646_v10 }
  0xe1   :  { %4809 = vrot.lane.b32.xlu0 %v4808_v45, %s4934_s21  ;;  %v4651_v45 = vunpack.i.l.bf16 %v5499_v16  ;;  %v5545_v48 = vpop.permute.xlu0 %4664  ;;  %v5575_v16 = vsel %vm331_vm0, %v4641_v5, %v4642_v47 }
  0xe2   :  { %7144 = vst [vmem:[#allocation29_spill] sm:$0xff] %v5545_v48  ;;  %v4666_v33 = vunpack.i.l.bf16 %v5545_v48  ;;  %v7149_v43 = vunpack.i.h.bf16 %v5545_v48 }
  0xe3   :  { %v5569_v35 = vsel %vm331_vm0, %v4651_v45, %v4652_v7 }
  0xe4   :  { %7146 = vst [vmem:[#allocation31_spill] sm:$0xff] %v5569_v35 }
  0xe5   :  { %4824 = vrot.lane.b32.xlu0 %v4823_v22, %s4933_s20  ;;  %v4637_v22 = vunpack.i.h.bf16 %v5494_v57 }
  0xe7   :  { %v5563_v13 = vsel %vm331_vm0, %v4636_v31, %v4637_v22 }
  0xe9   :  { %4834 = vrot.lane.b32.xlu0 %v4833_v46, %s4934_s21  ;;  %v4647_v46 = vunpack.i.h.bf16 %v4645_v26 }
  0xed   :  { %4839 = vrot.lane.b32.xlu0 %v5077_v23, %s4933_s20  ;;  %v5566_v23 = vsel %vm331_vm0, 0.0, %v4651_v45  ;;  %v5595_v45 = vsel %vm331_vm0, %v4646_v10, %v4647_v46 }
  0xee   :  { %7145 = vst [vmem:[#allocation30_spill] sm:$0xff] %v5566_v23 }
  0xf1   :  { %4849 = vrot.lane.b32.xlu0 %v4848_v59, %s4933_s20  ;;  %v4626_v59 = vunpack.i.l.bf16 %v5482_v38  ;;  %v5560_v38 = vsel %vm331_vm0, %v4627_v51, %v4636_v31 }
  0xf3   :  { %v5537_v19 = vsel %vm331_vm0, 0.0, %v4626_v59  ;;  %v5554_v57 = vsel %vm331_vm0, %v4626_v59, %v4627_v51  ;;  %v5572_v59 = vsel %vm331_vm0, %v4637_v22, %v4641_v5  ;;  %v4662_v5 = vunpack.i.h.bf16 %v5521_v61 }
  0xf4   :  { %v5608_v51 = vsel %vm331_vm0, %v4666_v33, %v7149_v43  ;;  %v7168_v8 = vrot.slane %v5554_v57, 5 }
  0xf5   :  { %611 = vrot.lane.b32.xlu0 %v5432_v9, %s4934_s21  ;;  %v4661_v9 = vunpack.i.l.bf16 %v5521_v61  ;;  %7150 = vst [vmem:[#allocation34_spill] sm:$0xff] %v5608_v51  ;;  %v5614_v46 = vsel %vm331_vm0, %v4662_v5, %v4666_v33 }
  0xf6   :  { %7151 = vst [vmem:[#allocation35_spill] sm:$0xff] %v5614_v46 }
  0xf7   :  { %v5600_v61 = vsel %vm331_vm0, %v4652_v7, %v4661_v9  ;;  %v5603_v26 = vsel %vm331_vm0, %v4661_v9, %v4662_v5 }
  0xf8   :  { %7147 = vst [vmem:[#allocation32_spill] sm:$0xff] %v5600_v61  ;;  %7148 = vst [vmem:[#allocation33_spill] sm:$0xff] %v5603_v26  ;;  %v7154_v61 = vunpack.i.l.bf16 %v5488_v44 }
 0x103   :  { %v4670_v28 = vpop.permute.xlu0 %4669 }
 0x104   :  { %v4671_v47 = vunpack.i.l.bf16 %v4670_v28  ;;  %v4672_v7 = vunpack.i.h.bf16 %v4670_v28 }
 0x106   :  { %v563_v15 = vsel %vm512_vm3, %v4632_v36, %v4672_v7 }
 0x107   :  { %v5551_v62 = vpop.permute.xlu1 %4689 }
 0x108   :  { %v4692_v2 = vunpack.i.h.bf16 %v5551_v62  ;;  %v4691_v22 = vunpack.i.l.bf16 %v5551_v62 }
 0x10a   :  { %v514_v10 = vsel %vm512_vm3, %v4691_v22, %v4692_v2  ;;  %v513_v5 = vsel %vm512_vm3, %v4671_v47, %v4691_v22  ;;  %v7152_v47 = vunpack.i.l.bf16 %v5488_v44 }
 0x10b   :  { %v5581_v49 = vpop.permute.xlu1 %4704  ;;  %v782_v6 = vrot.slane %v514_v10, 6  ;;  %v781_v46 = vrot.slane %v513_v5, 6  ;;  %v7155_v5 = vrot.slane %v5259_v34, 1 }
 0x10c   :  { %v4707_v62 = vunpack.i.h.bf16 %v5581_v49  ;;  %v564_v33 = vsel %vm512_vm3, %v4672_v7, %v7152_v47  ;;  %v815_v47 = vrot.slane %v563_v15, 3 }
 0x10d   :  { %v816_v36 = vrot.slane %v564_v33, 3  ;;  %v934_v15 = vsel %vm932_vm5, %v7155_v5, %v782_v6  ;;  %v7158_v33 = vrot.slane %v5181_v21, 1 }
 0x10e   :  { %v515_v51 = vsel %vm512_vm3, %v4692_v2, %v4707_v62 }
 0x10f   :  { %v5610_v31 = vpop.permute.xlu1 %4714  ;;  %v783_v12 = vrot.slane %v515_v51, 6  ;;  %v933_v44 = vsel %vm932_vm5, %v7158_v33, %v781_v46  ;;  %v7162_v33 = vrot.slane %v5313_v55, 1 }
 0x110   :  { %v4716_v9 = vunpack.i.l.bf16 %v5610_v31  ;;  %v5708_v25 = vsel %vm949_vm6, %v933_v44, %v815_v47  ;;  %v7163_v47 = vunpack.i.h.bf16 %v5503_v39 }
 0x112   :  { %v516_v22 = vsel %vm512_vm3, %v4707_v62, %v4716_v9  ;;  %v7153_v62 = vunpack.i.h.bf16 %v5610_v31 }
 0x113   :  { %v5627_v28 = vpop.permute.xlu1 %4724  ;;  %v784_v50 = vrot.slane %v516_v22, 6 }
 0x114   :  { %v7062_v48 = vunpack.i.h.bf16 %v5627_v28  ;;  %v7061_v43 = vunpack.i.l.bf16 %v5627_v28  ;;  %v565_v60 = vsel %vm512_vm3, %v7154_v61, %v7153_v62 }
 0x115   :  { %v5716_v20 = vsel %vm932_vm5, %v7162_v33, %v784_v50 }
 0x116   :  { %v5643_v26 = vsel %vm331_vm0, %v7061_v43, %v7062_v48 }
 0x117   :  { %v5645_v10 = vpop.permute.xlu0 %4674  ;;  %v5652_v7 = vpop.permute.xlu1 %4729  ;;  %v7157_v43 = vrot.slane %v5643_v26, 2 }
 0x118   :  { %v4732_v62 = vunpack.i.h.bf16 %v5652_v7  ;;  %v4677_v46 = vunpack.i.h.bf16 %v5645_v10 }
 0x119   :  { %v887_v48 = vsel %vm881_vm4, %v7157_v43, %v7156_v27  ;;  %v7159_v27 = vrot.slane %v5211_v53, 1  ;;  %v817_v43 = vrot.slane %v565_v60, 3 }
 0x11a   :  { %v904_v61 = vsel %vm898_vm7, %v887_v48, %v4996_v4  ;;  %v7161_v48 = vrot.slane %v5323_v29, 1  ;;  %v5725_v44 = vsel %vm512_vm3, %v7163_v47, %v4677_v46  ;;  %v7165_v47 = vunpack.i.l.bf16 %v5503_v39 }
 0x11b   :  { %v5675_v2 = vpop.permute.xlu0 %4679  ;;  %v5683_v6 = vpop.permute.xlu1 %4739  ;;  %v5690_v51 = vsel %vm915_vm8, %v904_v61, %v7159_v27  ;;  %v5703_v61 = vsel %vm949_vm6, %v934_v15, %v816_v36 }
 0x11c   :  { %v4681_v5 = vunpack.i.l.bf16 %v5675_v2  ;;  %v7160_v11 = vunpack.i.h.bf16 %v5675_v2  ;;  %v935_v22 = vsel %vm932_vm5, %v7161_v48, %v783_v12  ;;  %v4741_v36 = vunpack.i.l.bf16 %v5683_v6 }
 0x11d   :  { %v7164_v48 = vrot.slane %v5145_v54, 7  ;;  %v5731_v33 = vsel %vm949_vm6, %v935_v22, %v817_v43  ;;  %v7167_v43 = vrot.slane %v5259_v34, 1  ;;  %v7169_v34 = vrot.slane %v5121_v42, 7 }
 0x11e   :  { %v478_v32 = vsel %vm331_vm0, 0.0, %v4681_v5  ;;  %v462_v35 = vsel %vm331_vm0, %v4681_v5, %v7160_v11  ;;  %v517_v11 = vsel %vm512_vm3, %v4716_v9, %v4732_v62 }
 0x11f   :  { %v5705_v60 = vpop.permute.xlu0 %4684  ;;  %v668_v27 = vrot.slane %v462_v35, 2  ;;  %v4750_v15 = vpop.permute.xlu1 %4749  ;;  %v667_v12 = vrot.slane %v478_v32, 2  ;;  %v5741_v32 = vsel %vm512_vm3, %v4677_v46, %v7165_v47  ;;  %v7175_v47 = vunpack.i.h.bf16 %v5675_v2 }
 0x120   :  { %v7081_v5 = vunpack.i.h.bf16 %v5705_v60  ;;  %v4686_v35 = vunpack.i.l.bf16 %v5705_v60  ;;  %v4752_v9 = vunpack.i.h.bf16 %v4750_v15  ;;  %v4751_v18 = vunpack.i.l.bf16 %v4750_v15  ;;  %7166 = vst [vmem:[#allocation36_spill] sm:$0xff] %v5741_v32 }
 0x121   :  { %v883_v50 = vsel %vm881_vm4, %v668_v27, %v7164_v48  ;;  %v785_v48 = vrot.slane %v517_v11, 6 }
 0x122   :  { %v332_v3 = vsel %vm331_vm0, %v4686_v35, %v7081_v5  ;;  %v900_v40 = vsel %vm898_vm7, %v883_v50, %v4978_v0  ;;  %v5749_v5 = vsel %vm512_vm3, %v4732_v62, %v4741_v36  ;;  %v362_v11 = vsel %vm331_vm0, 0.0, %v4686_v35 }
 0x123   :  { %v4695_v37 = vpop.permute.xlu0 %4694  ;;  %v917_v22 = vsel %vm915_vm8, %v900_v40, %v7167_v43  ;;  %v5751_v23 = vpop.permute.xlu1 %4754  ;;  %v849_v46 = vsel %vm847_vm9, %v332_v3, %v7168_v8  ;;  %v882_v40 = vsel %vm881_vm4, %v667_v12, %v7169_v34  ;;  %v7170_v62 = vunpack.i.h.bf16 %v5627_v28 }
 0x124   :  { %v4697_v50 = vunpack.i.h.bf16 %v4695_v37  ;;  %v4696_v54 = vunpack.i.l.bf16 %v4695_v37  ;;  %v5768_v57 = vsel %vm331_vm0, %v4751_v18, %v4752_v9  ;;  %v4757_v8 = vunpack.i.h.bf16 %v5751_v23 }
 0x125   :  { %v5765_v15 = vsel %vm331_vm0, %v7170_v62, %v4751_v18  ;;  %v866_v42 = vsel %vm864_vm10, %v849_v46, %v668_v27  ;;  %v7171_v34 = vrot.slane %v5221_v63, 1  ;;  %v7172_v62 = vunpack.i.l.bf16 %v5627_v28 }
 0x126   :  { %v7173_v37 = vrot.slane %v5537_v19, 5  ;;  %v7174_v27 = vcombine.low %v4978_v0, %v4978_v0  ;;  %v529_v32 = vsel %vm512_vm3, %v4757_v8, 0.0  ;;  %v5804_v19 = vsel %vm331_vm0, %v7175_v47, %v4696_v54 }
 0x127   :  { %v5773_v35 = vpop.permute.xlu0 %4699  ;;  %v5779_v43 = vsel %vm932_vm5, %v7171_v34, %v785_v48  ;;  %v5784_v18 = vsel %vm331_vm0, %v4697_v50, %v7172_v62  ;;  %v5786_v9 = vpop.permute.xlu1 %4764  ;;  %v7087_v48 = vrot.slane %v5765_v15, 2  ;;  %v464_v34 = vsel %vm331_vm0, %v4696_v54, %v4697_v50 }
 0x128   :  { %v848_v3 = vsel %vm847_vm9, %v362_v11, %v7173_v37  ;;  %v899_v46 = vsel %vm898_vm7, %v882_v40, %v7174_v27  ;;  %v7086_v62 = vunpack.i.l.bf16 %v5786_v9  ;;  %v4701_v11 = vunpack.i.l.bf16 %v5773_v35 }
 0x129   :  { %v4263_v0 = vpack.c.bf16 %v917_v22, %v866_v42  ;;  %v519_v40 = vsel %vm512_vm3, %v4741_v36, %v4757_v8  ;;  %v865_v27 = vsel %vm864_vm10, %v848_v3, %v667_v12  ;;  %v670_v2 = vrot.slane %v464_v34, 2 }
 0x12a   :  { %v579_v50 = vsel %vm512_vm3, %v7086_v62, 0.0  ;;  %v7176_v54 = vunpack.i.l.bf16 %v5581_v49  ;;  %v7177_v22 = vunpack.i.h.bf16 %v5773_v35  ;;  %v7178_v8 = vrot.slane %v5181_v21, 1  ;;  %v1849_v49 = vld [vmem:[#allocation2 + $0x18] sm:$0xff] }
 0x12b   :  { %v5813_v28 = vpop.permute.xlu0 %4709  ;;  %4264 = vmatprep.subr.bf16.mxu1 %v4263_v0  ;;  %v4780_v62 = vpop.permute.xlu1 %4779  ;;  %v788_v37 = vrot.slane %v529_v32, 6  ;;  %v669_v12 = vrot.slane %v5804_v19, 2  ;;  %v7088_v19 = vunpack.i.l.bf16 %v5751_v23 }
 0x12c   :  { %v613_v47 = vsel %vm512_vm3, %v7176_v54, %v4701_v11  ;;  %v614_v36 = vsel %vm512_vm3, %v4701_v11, %v7177_v22  ;;  %v916_v42 = vsel %vm915_vm8, %v899_v46, %v7178_v8  ;;  %v4712_v34 = vunpack.i.h.bf16 %v5813_v28 }
 0x12d   :  { %v4265_v3 = vpack.c.bf16 %v916_v42, %v865_v27  ;;  %v787_v54 = vrot.slane %v519_v40, 6  ;;  %v822_v11 = vrot.slane %v579_v50, 3  ;;  %v4711_v0 = vunpack.i.l.bf16 %v5813_v28 }
 0x12e   :  { %v4267_v21 = vpack.c.bf16 %v614_v36, %v5703_v61  ;;  %v7181_v46 = vrot.slane %v5251_v41, 7  ;;  %v4767_v27 = vunpack.i.h.bf16 %v5786_v9  ;;  %v4270_v22 = vpack.c.bf16 %v613_v47, %v5708_v25 }
 0x12f   :  { %4266 = vmatpush1.bf16.msra.mxu1 %v4265_v3  ;;  %v4720_v40 = vpop.permute.xlu0 %4719  ;;  %v7182_v50 = vrot.slane %v5185_v24, 7  ;;  %v7183_v28 = vrot.slane %v5784_v18, 2  ;;  %v7184_v41 = vunpack.i.h.bf16 %v5705_v60  ;;  %v334_v8 = vsel %vm331_vm0, %v4711_v0, %v4712_v34  ;;  %v5856_v42 = vpop.permute.xlu1 %4794 }
 0x130   :  { %v5838_v32 = vsel %vm881_vm4, %v7087_v48, %v7181_v46  ;;  %4269 = vmatprep.subr.msk.bf16.mxu1 %vm5827_vm13, %v4267_v21  ;;  %v7185_v25 = vrot.slane %v5176_v14, 7  ;;  %v7186_v47 = vrot.slane %v5152_v58, 7  ;;  %v7187_v46 = vrot.slane %v5281_v30, 1 }
 0x131   :  { %v5848_v61 = vsel %vm881_vm4, %v7183_v28, %v7182_v50  ;;  %v333_v36 = vsel %vm331_vm0, %v7184_v41, %v4711_v0  ;;  %v4782_v50 = vunpack.i.h.bf16 %v4780_v62  ;;  %v4781_v28 = vunpack.i.l.bf16 %v4780_v62 }
 0x132   :  { %v885_v24 = vsel %vm881_vm4, %v670_v2, %v7185_v25  ;;  %v884_v3 = vsel %vm881_vm4, %v669_v12, %v7186_v47  ;;  %v940_v60 = vsel %vm932_vm5, %v7187_v46, %v788_v37  ;;  %v7188_v0 = vrot.slane %v5286_v17, 1 }
 0x133   :  { %v5873_v41 = vsel %vm949_vm6, %v940_v60, %v822_v11  ;;  %v4721_v14 = vunpack.i.l.bf16 %v4720_v40  ;;  %v7189_v25 = vrot.slane %v5563_v13, 5  ;;  %v5879_v47 = vsel %vm512_vm3, %v4767_v27, 0.0  ;;  %4272 = vmatpush1.bf16.msk.msra.mxu1 %vm5827_vm13, %v4270_v22  ;;  %v5891_v11 = vpop.permute.xlu0 %4734  ;;  %v4874_v13 = vld [vmem:[%s7033_s0 + $0x8] sm:$0x77]  ;;  %v5906_v60 = vpop.permute.xlu1 %4804 }
 0x134   :  { %v5870_v21 = vsel %vm932_vm5, %v7188_v0, %v787_v54  ;;  %v5884_v62 = vsel %vm512_vm3, %v7088_v19, %v4767_v27  ;;  %v7190_v37 = vrot.slane %v5560_v38, 5  ;;  %v5900_v27 = vld [vmem:[%s7034_s1] sm:$0xff]  ;;  %v4797_v38 = vunpack.i.h.bf16 %v5856_v42 }
 0x135   :  { %v851_v58 = vsel %vm847_vm9, %v334_v8, %v7189_v25  ;;  %v902_v8 = vsel %vm898_vm7, %v885_v24, %v4874_v13  ;;  %v4722_v46 = vunpack.i.h.bf16 %v4720_v40  ;;  %v7192_v24 = vunpack.i.l.bf16 %v5645_v10 }
 0x136   :  { %v850_v54 = vsel %vm847_vm9, %v333_v36, %v7190_v37  ;;  %v7191_v36 = vunpack.i.h.bf16 %v5610_v31  ;;  %v868_v0 = vsel %vm864_vm10, %v851_v58, %v670_v2  ;;  %v5917_v13 = vsel %vm512_vm3, %v4781_v28, %v4782_v50  ;;  %4240 = vmatmul.mubr.msk.f32.vlgmr.msra.gmra.mrb[0].mxu1 %vm967_vm11, %v5900_v27 }
 0x137   :  { %v5914_v37 = vsel %vm512_vm3, %v7192_v24, %v4781_v28  ;;  %v4737_v31 = vunpack.i.h.bf16 %v5891_v11  ;;  %v7193_v48 = vrot.slane %v5313_v55, 1  ;;  %v7194_v10 = vcombine.low %v4983_v1, %v4983_v1  ;;  %v4745_v19 = vpop.permute.xlu0 %4744 }
 0x138   :  { %v566_v22 = vsel %vm512_vm3, %v7191_v36, %v4721_v14  ;;  %v4736_v36 = vunpack.i.l.bf16 %v5891_v11  ;;  %v867_v25 = vsel %vm864_vm10, %v850_v54, %v669_v12  ;;  %v7195_v55 = vmov 0.0  }
 0x139   :  { %v818_v40 = vrot.slane %v566_v22, 3  ;;  %v919_v2 = vsel %vm915_vm8, %v902_v8, %v7193_v48  ;;  %v901_v58 = vsel %vm898_vm7, %v884_v3, %v7194_v10  ;;  %v7089_v22 = vunpack.i.h.bf16 %v5906_v60  ;;  %1123 = vmatprep.mubr.f32.mxu1 %v7195_v55 }
 0x13a   :  { %v4273_v24 = vpack.c.bf16 %v919_v2, %v868_v0  ;;  %v5937_v8 = vsel %vm512_vm3, %v4782_v50, %v4797_v38  ;;  %v7196_v1 = vunpack.i.l.bf16 %v5652_v7  ;;  %v335_v0 = vsel %vm331_vm0, %v4712_v34, %v4736_v36 }
 0x13b   :  { %v953_v28 = vsel %vm949_vm6, %v5716_v20, %v818_v40  ;;  %v5943_v20 = vpop.permute.xlu1 %4814  ;;  %v336_v12 = vsel %vm331_vm0, %v4736_v36, %v4737_v31  ;;  %v7197_v54 = vrot.slane %v5323_v29, 1  ;;  %v790_v2 = vrot.slane %v5917_v13, 6 }
 0x13c   :  { %v616_v3 = vsel %vm512_vm3, %v4722_v46, %v7196_v1  ;;  %4274 = vmatprep.subr.bf16.mxu1 %v4273_v24  ;;  %v4796_v1 = vunpack.i.l.bf16 %v5856_v42  ;;  %v7198_v48 = vunpack.i.h.bf16 %v5773_v35  ;;  %v7200_v29 = vunpack.i.l.bf16 %v5503_v39  ;;  %v7252_v42 = vld [vmem:[#allocation32_spill] sm:$0xff] }
 0x13d   :  { %v4277_v40 = vpack.c.bf16 %v616_v3, %v953_v28  ;;  %v918_v50 = vsel %vm915_vm8, %v901_v58, %v7197_v54  ;;  %v7199_v3 = vunpack.i.h.bf16 %v5683_v6  ;;  %v4746_v24 = vunpack.i.l.bf16 %v4745_v19  ;;  %v4760_v54 = vpop.permute.xlu0 %4759 }
 0x13e   :  { %v615_v10 = vsel %vm512_vm3, %v7198_v48, %v4722_v46  ;;  %v4275_v28 = vpack.c.bf16 %v918_v50, %v867_v25  ;;  %v5966_v58 = vsel %vm512_vm3, %v7200_v29, %v7089_v22  ;;  %v7201_v35 = vunpack.i.l.bf16 %v5906_v60 }
 0x13f   :  { %v567_v36 = vsel %vm512_vm3, %v4721_v14, %v7199_v3  ;;  %v7202_v25 = vrot.slane %v5572_v59, 5  ;;  %v4817_v14 = vunpack.i.h.bf16 %v5943_v20  ;;  %v5977_v50 = vpop.permute.xlu1 %4819  ;;  %v7203_v39 = vrot.slane %v5575_v16, 5 }
 0x140   :  { %v5971_v46 = vsel %vm512_vm3, %v4797_v38, %v7201_v35  ;;  %4276 = vmatpush1.bf16.msra.mxu1 %v4275_v28  ;;  %v4816_v29 = vunpack.i.l.bf16 %v5943_v20  ;;  %v4747_v34 = vunpack.i.h.bf16 %v4745_v19  ;;  %v7204_v22 = vunpack.i.h.bf16 %v5683_v6 }
 0x141   :  { %v852_v48 = vsel %vm847_vm9, %v335_v0, %v7202_v25  ;;  %v853_v3 = vsel %vm847_vm9, %v336_v12, %v7203_v39  ;;  %4279 = vmatprep.subr.msk.bf16.mxu1 %vm5827_vm13, %v4277_v40  ;;  %v4762_v59 = vunpack.i.h.bf16 %v4760_v54  ;;  %v819_v0 = vrot.slane %v567_v36, 3 }
 0x142   :  { %v568_v38 = vsel %vm512_vm3, %v7204_v22, %v4746_v24  ;;  %v4280_v28 = vpack.c.bf16 %v615_v10, %v5731_v33  ;;  %v825_v35 = vrot.slane %v5966_v58, 3  ;;  %v7205_v16 = vrot.slane %v5749_v5, 6  ;;  %v6003_v10 = vpop.permute.xlu0 %4769 }
 0x143   :  { %v820_v25 = vrot.slane %v568_v38, 3  ;;  %v7206_v12 = vrot.slane %v5211_v53, 1  ;;  %v4761_v39 = vunpack.i.l.bf16 %v4760_v54  ;;  %v7207_v6 = vrot.slane %v5643_v26, 2 }
 0x144   :  { %v7208_v40 = vcombine.low %v4996_v4, %v4996_v4  ;;  %v792_v36 = vrot.slane %v5971_v46, 6  ;;  %4282 = vmatpush1.bf16.msk.msra.mxu1 %vm5827_vm13, %v4280_v28  ;;  %v7209_v26 = vrot.slane %v5784_v18, 2  ;;  %v6020_v4 = vsel %vm331_vm0, %v4816_v29, %v4817_v14 }
 0x145   :  { %v938_v19 = vsel %vm932_vm5, %v7206_v12, %v7205_v16  ;;  %v870_v22 = vsel %vm864_vm10, %v853_v3, %v7207_v6  ;;  %v6013_v3 = vpop.permute.xlu1 %4829  ;;  %v7211_v28 = vunpack.i.l.bf16 %v5751_v23  ;;  %v338_v18 = vsel %vm331_vm0, %v4761_v39, %v4762_v59 }
 0x146   :  { %v903_v33 = vsel %vm898_vm7, %v5848_v61, %v7208_v40  ;;  %v955_v5 = vsel %vm949_vm6, %v938_v19, %v820_v25  ;;  %v4283_v53 = vpack.c.bf16 %v5690_v51, %v870_v22  ;;  %v869_v54 = vsel %vm864_vm10, %v852_v48, %v7209_v26  ;;  %v6044_v6 = vpop.permute.xlu0 %4774 }
 0x147   :  { %v7210_v61 = vunpack.i.l.bf16 %v5652_v7  ;;  %v618_v51 = vsel %vm512_vm3, %v4747_v34, %v7211_v28  ;;  %v4822_v25 = vunpack.i.h.bf16 %v5977_v50  ;;  %v337_v16 = vsel %vm331_vm0, %v4737_v31, %v4761_v39  ;;  %4243 = vmatmul.mubr.msk.f32.vlgmr.msra.gmra.mrb[2].mxu1 %vm967_vm11, %v5900_v27 }
 0x148   :  { %v4287_v48 = vpack.c.bf16 %v618_v51, %v955_v5  ;;  %4284 = vmatprep.subr.bf16.mxu1 %v4283_v53  ;;  %v7212_v12 = vrot.slane %v5221_v63, 1  ;;  %v7213_v19 = vunpack.i.l.bf16 %v5786_v9  ;;  %v4831_v11 = vunpack.i.l.bf16 %v6013_v3  ;;  %1194 = vmatprep.mubr.f32.mxu1 %v7195_v55  ;;  %v4875_v51 = vld [vmem:[%s7033_s0 + $0x18] sm:$0x77] }
 0x149   :  { %v617_v38 = vsel %vm512_vm3, %v7210_v61, %v4747_v34  ;;  %v954_v34 = vsel %vm949_vm6, %v5779_v43, %v819_v0  ;;  %v680_v31 = vrot.slane %v6020_v4, 2  ;;  %v4771_v63 = vunpack.i.l.bf16 %v6003_v10  ;;  %v4845_v39 = vpop.permute.xlu1 %4844 }
 0x14a   :  { %v920_v7 = vsel %vm915_vm8, %v903_v33, %v7212_v12  ;;  %v569_v23 = vsel %vm512_vm3, %v4746_v24, %v7213_v19  ;;  %v7214_v9 = vrot.slane %v5595_v45, 5  ;;  %v7215_v22 = vrot.slane %v5318_v52, 7 }
 0x14b   :  { %v4285_v59 = vpack.c.bf16 %v920_v7, %v869_v54  ;;  %v7216_v43 = vrot.slane %v5768_v57, 2  ;;  %v4290_v40 = vpack.c.bf16 %v617_v38, %v954_v34  ;;  %v7217_v33 = vrot.slane %v5592_v56, 5  ;;  %v4785_v7 = vpop.permute.xlu0 %4784 }
 0x14c   :  { %v855_v24 = vsel %vm847_vm9, %v338_v18, %v7214_v9  ;;  %v4772_v53 = vunpack.i.h.bf16 %v6003_v10  ;;  %v4776_v45 = vunpack.i.l.bf16 %v6044_v6  ;;  %v821_v26 = vrot.slane %v569_v23, 3 }
 0x14d   :  { %v889_v0 = vsel %vm881_vm4, %v7216_v43, %v7215_v22  ;;  %v854_v5 = vsel %vm847_vm9, %v337_v16, %v7217_v33  ;;  %4286 = vmatpush1.bf16.msra.mxu1 %v4285_v59  ;;  %v4821_v54 = vunpack.i.l.bf16 %v5977_v50  ;;  %v7218_v52 = vunpack.i.l.bf16 %v5906_v60  ;;  %v7220_v16 = vld [vmem:[#allocation8_spill] sm:$0xff]  ;;  %v6092_v59 = vpop.permute.xlu1 %609 }
 0x14e   :  { %4289 = vmatprep.subr.msk.bf16.mxu1 %vm5827_vm13, %v4287_v48  ;;  %v4846_v38 = vunpack.i.l.bf16 %v4845_v39  ;;  %v6073_v56 = vsel %vm512_vm3, %v4822_v25, %v4831_v11  ;;  %v7219_v10 = vmov %v7216_v43  ;;  %v906_v18 = vsel %vm898_vm7, %v889_v0, %v4875_v51 }
 0x14f   :  { %v6066_v61 = vsel %vm512_vm3, %v7218_v52, %v4822_v25  ;;  %v872_v28 = vsel %vm864_vm10, %v855_v24, %v7219_v10  ;;  %v7221_v12 = vcombine.low %v7220_v16, %v7220_v16  ;;  %v479_v25 = vsel %vm331_vm0, 0.0, %v4771_v63  ;;  %v6112_v10 = vpop.permute.xlu0 %4789 }
 0x150   :  { %v4847_v19 = vunpack.i.h.bf16 %v4845_v39  ;;  %v4777_v57 = vunpack.i.h.bf16 %v6044_v6  ;;  %v7222_v23 = vrot.slane %v5765_v15, 2  ;;  %v469_v9 = vsel %vm331_vm0, %v4771_v63, %v4772_v53 }
 0x151   :  { %v905_v48 = vsel %vm898_vm7, %v5838_v32, %v7221_v12  ;;  %4292 = vmatpush1.bf16.msk.msra.mxu1 %vm5827_vm13, %v4290_v40  ;;  %v6100_v32 = vsel %vm331_vm0, %v4817_v14, %v4846_v38  ;;  %v363_v39 = vsel %vm331_vm0, 0.0, %v4776_v45  ;;  %v7223_v24 = vrot.slane %v5281_v30, 1 }
 0x152   :  { %v871_v34 = vsel %vm864_vm10, %v854_v5, %v7222_v23  ;;  %v7224_v43 = vrot.slane %v5286_v17, 1  ;;  %v4787_v63 = vunpack.i.h.bf16 %v4785_v7  ;;  %v4786_v33 = vunpack.i.l.bf16 %v4785_v7 }
 0x153   :  { %v923_v15 = vsel %vm915_vm8, %v906_v18, %v7223_v24  ;;  %v956_v40 = vsel %vm949_vm6, %v5870_v21, %v821_v26  ;;  %v793_v5 = vrot.slane %v6066_v61, 6  ;;  %v675_v14 = vrot.slane %v479_v25, 2  ;;  %v6143_v25 = vpop.permute.xlu1 %4854 }
 0x154   :  { %v4293_v22 = vpack.c.bf16 %v923_v15, %v872_v28  ;;  %v922_v0 = vsel %vm915_vm8, %v905_v48, %v7224_v43  ;;  %v4832_v30 = vunpack.i.h.bf16 %v6013_v3  ;;  %v6116_v51 = vsel %vm331_vm0, %v4846_v38, %v4847_v19  ;;  %v7225_v28 = vld [vmem:[#allocation30_spill] sm:$0xff]  ;;  %4246 = vmatmul.mubr.msk.f32.vlgmr.msra.gmra.mrb[4].mxu1 %vm967_vm11, %v5900_v27  ;;  %v7228_v19 = vld [vmem:[#allocation13_spill] sm:$0xff] }
 0x155   :  { %v4295_v52 = vpack.c.bf16 %v922_v0, %v871_v34  ;;  %v681_v17 = vrot.slane %v6100_v32, 2  ;;  %v7226_v18 = vrot.slane %v7225_v28, 5  ;;  %v794_v21 = vrot.slane %v6073_v56, 6  ;;  %1265 = vmatprep.mubr.f32.mxu1 %v7195_v55  ;;  %v7235_v28 = vld [vmem:[#allocation23_spill] sm:$0xff]  ;;  %v4878_v56 = vld [vmem:[%s7033_s0 + $0x30] sm:$0x77] }
 0x156   :  { %4294 = vmatprep.subr.bf16.mxu1 %v4293_v22  ;;  %v676_v26 = vrot.slane %v469_v9, 2  ;;  %v6128_v12 = vsel %vm331_vm0, %v4787_v63, %v4816_v29  ;;  %v6131_v38 = vsel %vm331_vm0, %v4772_v53, %v4786_v33  ;;  %v339_v48 = vsel %vm331_vm0, %v4776_v45, %v4777_v57 }
 0x157   :  { %v856_v16 = vsel %vm847_vm9, %v363_v39, %v7226_v18  ;;  %4296 = vmatpush1.bf16.msra.mxu1 %v4295_v52  ;;  %v7227_v7 = vpack.c.bf16 %v5879_v47, %v5873_v41  ;;  %v471_v20 = vsel %vm331_vm0, %v4786_v33, %v4787_v63  ;;  %v4792_v29 = vunpack.i.h.bf16 %v6112_v10  ;;  %v6153_v47 = vpop.permute.xlu0 %4799  ;;  %v7230_v39 = vld [vmem:[#allocation22_spill] sm:$0xff]  ;;  %v7233_v63 = vld [vmem:[#allocation17_spill] sm:$0xff] }
 0x158   :  { %v4791_v53 = vunpack.i.l.bf16 %v6112_v10  ;;  %v7229_v23 = vrot.slane %v7228_v19, 7  ;;  %v682_v45 = vrot.slane %v6116_v51, 2  ;;  %v873_v9 = vsel %vm864_vm10, %v856_v16, %v675_v14  ;;  %v7239_v19 = vld [vmem:[#allocation14_spill] sm:$0xff]  ;;  %v7274_v10 = vld [vmem:[#allocation20_spill] sm:$0xff] }
 0x159   :  { %4299 = vmatprep.subr.msk.bf16.mxu1 %vm5827_vm13, %v7227_v7  ;;  %v4300_v41 = vpack.c.bf16 %v5884_v62, %v956_v40  ;;  %v7231_v24 = vrot.slane %v7230_v39, 7  ;;  %v679_v22 = vrot.slane %v6128_v12, 2  ;;  %v677_v43 = vrot.slane %v6131_v38, 2  ;;  %v7237_v38 = vld [vmem:[#allocation31_spill] sm:$0xff]  ;;  %v7241_v39 = vld [vmem:[#allocation10_spill] sm:$0xff] }
 0x15a   :  { %v890_v34 = vsel %vm881_vm4, %v675_v14, %v7229_v23  ;;  %v7232_v0 = vrot.slane %v5914_v37, 6  ;;  %v7234_v33 = vrot.slane %v7233_v63, 1  ;;  %v678_v62 = vrot.slane %v471_v20, 2 }
 0x15b   :  { %v6160_v15 = vsel %vm881_vm4, %v681_v17, %v7231_v24  ;;  %4302 = vmatpush1.bf16.msk.msra.mxu1 %vm5827_vm13, %v4300_v41  ;;  %v4857_v40 = vunpack.i.h.bf16 %v6143_v25  ;;  %v4856_v52 = vunpack.i.l.bf16 %v6143_v25  ;;  %v7236_v18 = vrot.slane %v7235_v28, 1 }
 0x15c   :  { %v941_v14 = vsel %vm932_vm5, %v7234_v33, %v7232_v0  ;;  %v621_v37 = vsel %vm512_vm3, %v4791_v53, %v4792_v29  ;;  %v7238_v7 = vrot.slane %v7237_v38, 5  ;;  %v7240_v23 = vrot.slane %v7239_v19, 7 }
 0x15d   :  { %v942_v16 = vsel %vm932_vm5, %v7236_v18, %v790_v2  ;;  %v7242_v24 = vcombine.low %v7241_v39, %v7241_v39  ;;  %v4876_v2 = vld [vmem:[%s7033_s0 + $0x20] sm:$0x77]  ;;  %v7243_v18 = vrot.slane %v7233_v63, 1  ;;  %v4802_v38 = vunpack.i.h.bf16 %v6153_v47 }
 0x15e   :  { %v857_v20 = vsel %vm847_vm9, %v339_v48, %v7238_v7  ;;  %v891_v41 = vsel %vm881_vm4, %v676_v26, %v7240_v23  ;;  %v4810_v7 = vpop.permute.xlu0 %4809  ;;  %v7244_v19 = vrot.slane %v5725_v44, 3  ;;  %4249 = vmatmul.mubr.msk.f32.vlgmr.msra.gmra.mrb[6].mxu1 %vm967_vm11, %v5900_v27  ;;  %v4801_v63 = vunpack.i.l.bf16 %v6153_v47 }
 0x15f   :  { %v907_v13 = vsel %vm898_vm7, %v890_v34, %v7242_v24  ;;  %v874_v0 = vsel %vm864_vm10, %v857_v20, %v676_v26  ;;  %v908_v33 = vsel %vm898_vm7, %v891_v41, %v4876_v2  ;;  %v7245_v34 = vld [vmem:[#allocation36_spill] sm:$0xff]  ;;  %v7247_v20 = vrot.slane %v7235_v28, 1  ;;  %v7248_v41 = vld [vmem:[#allocation18_spill] sm:$0xff]  ;;  %1353 = vmatprep.mubr.f32.mxu1 %v7195_v55 }
 0x160   :  { %v924_v48 = vsel %vm915_vm8, %v907_v13, %v7243_v18  ;;  %v958_v23 = vsel %vm949_vm6, %v941_v14, %v7244_v19  ;;  %v7246_v39 = vrot.slane %v7245_v34, 3  ;;  %v7249_v13 = vrot.slane %v7248_v41, 7  ;;  %v7250_v19 = vld [vmem:[#allocation15_spill] sm:$0xff] }
 0x161   :  { %v925_v24 = vsel %vm915_vm8, %v908_v33, %v7247_v20  ;;  %v620_v14 = vsel %vm512_vm3, %v4796_v1, %v4791_v53  ;;  %v4305_v2 = vpack.c.bf16 %v924_v48, %v873_v9  ;;  %v340_v47 = vsel %vm331_vm0, %v4777_v57, %v4801_v63 }
 0x162   :  { %v959_v26 = vsel %vm949_vm6, %v942_v16, %v7246_v39  ;;  %v6217_v44 = vsel %vm881_vm4, %v679_v22, %v7249_v13  ;;  %v4303_v28 = vpack.c.bf16 %v925_v24, %v874_v0  ;;  %v341_v33 = vsel %vm331_vm0, %v4801_v63, %v4802_v38  ;;  %v6233_v53 = vpop.permute.xlu0 %4824  ;;  %v7256_v0 = vld [vmem:[#allocation16_spill] sm:$0xff] }
 0x163   :  { %v4307_v16 = vpack.c.bf16 %v621_v37, %v959_v26  ;;  %v4811_v18 = vunpack.i.l.bf16 %v4810_v7  ;;  %v7251_v34 = vrot.slane %v7250_v19, 7  ;;  %v7253_v20 = vrot.slane %v7252_v42, 5  ;;  %v7254_v37 = vld [vmem:[#allocation33_spill] sm:$0xff] }
 0x164   :  { %4304 = vmatprep.subr.bf16.mxu1 %v4303_v28  ;;  %v7255_v9 = vrot.slane %v7254_v37, 5  ;;  %v7257_v57 = vrot.slane %v7256_v0, 7  ;;  %v4310_v26 = vpack.c.bf16 %v620_v14, %v958_v23  ;;  %v4812_v24 = vunpack.i.h.bf16 %v4810_v7 }
 0x165   :  { %v892_v39 = vsel %vm881_vm4, %v677_v43, %v7251_v34  ;;  %v858_v1 = vsel %vm847_vm9, %v340_v47, %v7253_v20  ;;  %4306 = vmatpush1.bf16.msra.mxu1 %v4305_v2  ;;  %v7258_v63 = vunpack.i.h.bf16 %v5906_v60  ;;  %v4827_v13 = vunpack.i.h.bf16 %v6233_v53  ;;  %v7259_v60 = vld [vmem:[#allocation26_spill] sm:$0xff]  ;;  %v4877_v2 = vld [vmem:[%s7033_s0 + $0x28] sm:$0x77] }
 0x166   :  { %v859_v6 = vsel %vm847_vm9, %v341_v33, %v7255_v9  ;;  %v893_v48 = vsel %vm881_vm4, %v678_v62, %v7257_v57  ;;  %v6248_v28 = vsel %vm512_vm3, %v4857_v40, 0.0  ;;  %4309 = vmatprep.subr.msk.bf16.mxu1 %vm5827_vm13, %v4307_v16  ;;  %v4826_v33 = vunpack.i.l.bf16 %v6233_v53  ;;  %v7261_v16 = vld [vmem:[#allocation9_spill] sm:$0xff] }
 0x167   :  { %v573_v41 = vsel %vm512_vm3, %v7258_v63, %v4811_v18  ;;  %v876_v23 = vsel %vm864_vm10, %v859_v6, %v678_v62  ;;  %v7260_v7 = vrot.slane %v7259_v60, 1  ;;  %v910_v19 = vsel %vm898_vm7, %v893_v48, %v4877_v2  ;;  %v7264_v6 = vld [vmem:[#allocation27_spill] sm:$0xff] }
 0x168   :  { %v826_v47 = vrot.slane %v573_v41, 3  ;;  %v875_v34 = vsel %vm864_vm10, %v858_v1, %v677_v43  ;;  %v7262_v42 = vcombine.low %v7261_v16, %v7261_v16  ;;  %v6271_v46 = vsel %vm512_vm3, %v4831_v11, %v4856_v52  ;;  %v6280_v1 = vpop.permute.xlu0 %4834 }
 0x169   :  { %v944_v14 = vsel %vm932_vm5, %v7260_v7, %v792_v36  ;;  %v343_v62 = vsel %vm331_vm0, %v4826_v33, %v4827_v13  ;;  %v7263_v37 = vmov %v7260_v7  ;;  %4312 = vmatpush1.bf16.msk.msra.mxu1 %vm5827_vm13, %v4310_v26  ;;  %v623_v11 = vsel %vm512_vm3, %v4812_v24, %v4821_v54 }
 0x16a   :  { %v909_v20 = vsel %vm898_vm7, %v892_v39, %v7262_v42  ;;  %v961_v36 = vsel %vm949_vm6, %v944_v14, %v826_v47  ;;  %v927_v43 = vsel %vm915_vm8, %v910_v19, %v7263_v37  ;;  %v342_v39 = vsel %vm331_vm0, %v4802_v38, %v4826_v33  ;;  %v7268_v33 = vld [vmem:[#allocation34_spill] sm:$0xff]  ;;  %v7270_v14 = vld [vmem:[#allocation21_spill] sm:$0xff]  ;;  %v7276_v37 = vld [vmem:[#allocation11_spill] sm:$0xff] }
 0x16b   :  { %v4313_v9 = vpack.c.bf16 %v927_v43, %v876_v23  ;;  %v7265_v0 = vrot.slane %v7264_v6, 1  ;;  %v7266_v48 = vrot.slane %v5937_v8, 6  ;;  %v4317_v47 = vpack.c.bf16 %v623_v11, %v961_v36 }
 0x16c   :  { %v4836_v26 = vunpack.i.l.bf16 %v6280_v1  ;;  %v6298_v7 = vsel %vm512_vm3, %v4856_v52, 0.0  ;;  %v7269_v23 = vrot.slane %v7268_v33, 5  ;;  %v7271_v2 = vrot.slane %v7270_v14, 7  ;;  %4252 = vmatmul.mubr.msk.f32.vlgmr.msra.gmra.mrb[8].mxu1 %vm967_vm11, %v5900_v27 }
 0x16d   :  { %v926_v57 = vsel %vm915_vm8, %v909_v20, %v7265_v0  ;;  %v7267_v63 = vmov %v7265_v0  ;;  %4314 = vmatprep.subr.bf16.mxu1 %v4313_v9  ;;  %v574_v52 = vsel %vm512_vm3, %v4811_v18, %v4832_v30  ;;  %v622_v58 = vsel %vm512_vm3, %v4792_v29, %v4812_v24  ;;  %v4840_v20 = vpop.permute.xlu0 %4839  ;;  %1424 = vmatprep.mubr.f32.mxu1 %v7195_v55 }
 0x16e   :  { %v943_v41 = vsel %vm932_vm5, %v7267_v63, %v7266_v48  ;;  %v4315_v60 = vpack.c.bf16 %v926_v57, %v875_v34  ;;  %v861_v8 = vsel %vm847_vm9, %v343_v62, %v7269_v23  ;;  %v895_v19 = vsel %vm881_vm4, %v680_v31, %v7271_v2  ;;  %v7281_v48 = vld [vmem:[#allocation29_spill] sm:$0xff] }
 0x16f   :  { %v960_v38 = vsel %vm949_vm6, %v943_v41, %v825_v35  ;;  %v7272_v35 = vld [vmem:[#allocation35_spill] sm:$0xff]  ;;  %v575_v42 = vsel %vm512_vm3, %v4832_v30, %v4836_v26  ;;  %v7275_v18 = vrot.slane %v7274_v10, 1  ;;  %v4837_v24 = vunpack.i.h.bf16 %v6280_v1 }
 0x170   :  { %v7273_v34 = vrot.slane %v7272_v35, 5  ;;  %4316 = vmatpush1.bf16.msra.mxu1 %v4315_v60  ;;  %v828_v36 = vrot.slane %v575_v42, 3  ;;  %v4842_v62 = vunpack.i.h.bf16 %v4840_v20  ;;  %v4841_v3 = vunpack.i.l.bf16 %v4840_v20  ;;  %v7283_v35 = vld [vmem:[#allocation28_spill] sm:$0xff] }
 0x171   :  { %v946_v29 = vsel %vm932_vm5, %v7275_v18, %v794_v21  ;;  %4319 = vmatprep.subr.msk.bf16.mxu1 %vm5827_vm13, %v4317_v47  ;;  %v878_v30 = vsel %vm864_vm10, %v861_v8, %v680_v31  ;;  %v912_v21 = vsel %vm898_vm7, %v895_v19, %v4878_v56  ;;  %v7277_v43 = vcombine.low %v7276_v37, %v7276_v37  ;;  %v7279_v31 = vld [vmem:[#allocation19_spill] sm:$0xff]  ;;  %v7285_v42 = vld [vmem:[#allocation12_spill] sm:$0xff] }
 0x172   :  { %v860_v16 = vsel %vm847_vm9, %v342_v39, %v7273_v34  ;;  %v4320_v39 = vpack.c.bf16 %v622_v58, %v960_v38  ;;  %v963_v9 = vsel %vm949_vm6, %v946_v29, %v828_v36  ;;  %v7278_v6 = vmov %v7275_v18  ;;  %v4850_v38 = vpop.permute.xlu0 %4849  ;;  %v7290_v56 = vld [vmem:[#allocation24_spill] sm:$0xff] }
 0x173   :  { %v911_v11 = vsel %vm898_vm7, %v6217_v44, %v7277_v43  ;;  %v929_v4 = vsel %vm915_vm8, %v912_v21, %v7278_v6  ;;  %v7280_v0 = vrot.slane %v7279_v31, 1  ;;  %v7282_v63 = vunpack.i.h.bf16 %v7281_v48 }
 0x174   :  { %v409_v47 = vsel %vm331_vm0, %v4841_v3, %v4842_v62  ;;  %v4323_v60 = vpack.c.bf16 %v929_v4, %v878_v30  ;;  %v877_v44 = vsel %vm864_vm10, %v860_v16, %v679_v22  ;;  %v796_v33 = vrot.slane %v6298_v7, 6  ;;  %4322 = vmatpush1.bf16.msk.msra.mxu1 %vm5827_vm13, %v4320_v39  ;;  %v7287_v62 = vld [vmem:[#allocation25_spill] sm:$0xff] }
 0x175   :  { %v928_v57 = vsel %vm915_vm8, %v911_v11, %v7280_v0  ;;  %v408_v41 = vsel %vm331_vm0, %v7282_v63, %v4841_v3  ;;  %v827_v23 = vrot.slane %v574_v52, 3  ;;  %v625_v8 = vsel %vm512_vm3, %v4837_v24, %v6092_v59  ;;  %v4879_v52 = vld [vmem:[%s7033_s0 + $0x38] sm:$0x77]  ;;  %v1935_v63 = vld [vmem:[#allocation2 + $0x2c8] sm:$0x3] }
 0x176   :  { %v4852_v14 = vunpack.i.h.bf16 %v4850_v38  ;;  %v4327_v2 = vpack.c.bf16 %v625_v8, %v963_v9  ;;  %v647_v19 = vrot.slane %v408_v41, 5  ;;  %4324 = vmatprep.subr.bf16.mxu1 %v4323_v60  ;;  %v4851_v58 = vunpack.i.l.bf16 %v4850_v38  ;;  %v1846_v41 = vld [vmem:[#allocation2] sm:$0xff]  ;;  %v1873_v8 = vld [vmem:[#allocation2 + $0xd8] sm:$0xff] }
 0x177   :  { %v7284_v34 = vrot.slane %v7283_v35, 7  ;;  %v648_v22 = vrot.slane %v409_v47, 5  ;;  %v4325_v7 = vpack.c.bf16 %v928_v57, %v877_v44  ;;  %v7286_v20 = vcombine.low %v7285_v42, %v7285_v42  ;;  %4255 = vmatmul.mubr.msk.f32.vlgmr.msra.gmra.mrb[10].mxu1 %vm967_vm11, %v5900_v27  ;;  %v1871_v57 = vld [vmem:[#allocation2 + $0xc8] sm:$0xff]  ;;  %v1910_v47 = vld [vmem:[#allocation2 + $0x200] sm:$0x3] }
 0x178   :  { %v624_v18 = vsel %vm512_vm3, %v4821_v54, %v4837_v24  ;;  %v344_v29 = vsel %vm331_vm0, %v4827_v13, %v4851_v58  ;;  %v345_v36 = vsel %vm331_vm0, %v4851_v58, %v4852_v14  ;;  %v7288_v3 = vrot.slane %v7287_v62, 1  ;;  %1495 = vmatprep.mubr.f32.mxu1 %v7195_v55  ;;  %v612_v24 = vpop.permute.xlu0 %611  ;;  %v1870_v44 = vld [vmem:[#allocation2 + $0xc0] sm:$0xff]  ;;  %v1937_v14 = vld [vmem:[#allocation2 + $0x2d8] sm:$0x3]  ;;  %v6452_v42 = vld [vmem:[#allocation2 + $0x228] sm:$0x3] }
 0x179   :  { %v897_v12 = vsel %vm881_vm4, %v682_v45, %v7284_v34  ;;  %v913_v10 = vsel %vm898_vm7, %v6160_v15, %v7286_v20  ;;  %v7289_v15 = vmov %v7280_v0  ;;  %4326 = vmatpush1.bf16.msra.mxu1 %v4325_v7  ;;  %v862_v54 = vsel %vm847_vm9, %v344_v29, %v647_v19  ;;  %v1911_v0 = vld [vmem:[#allocation2 + $0x208] sm:$0x3]  ;;  %v1934_v38 = vld [vmem:[#allocation2 + $0x2c0] sm:$0x3]  ;;  %v6446_v7 = vld [vmem:[#allocation2 + $0xd0] sm:$0xff] }
 0x17a   :  { %v914_v16 = vsel %vm898_vm7, %v897_v12, %v4879_v52  ;;  %v930_v30 = vsel %vm915_vm8, %v913_v10, %v7288_v3  ;;  %v945_v50 = vsel %vm932_vm5, %v7289_v15, %v793_v5  ;;  %v863_v53 = vsel %vm847_vm9, %v345_v36, %v648_v22  ;;  %4329 = vmatprep.subr.msk.bf16.mxu1 %vm5827_vm13, %v4327_v2  ;;  %v6442_v12 = vld [vmem:[#allocation2 + $0x10] sm:$0xff]  ;;  %v6454_v20 = vld [vmem:[#allocation2 + $0xe8] sm:$0xff]  ;;  %v6460_v29 = vld [vmem:[#allocation2 + $0x220] sm:$0x3] }
 0x17b   :  { %v962_v13 = vsel %vm949_vm6, %v945_v50, %v827_v23  ;;  %v880_v61 = vsel %vm864_vm10, %v863_v53, %v682_v45  ;;  %v7291_v21 = vrot.slane %v7290_v56, 1  ;;  %v879_v37 = vsel %vm864_vm10, %v862_v54, %v681_v17  ;;  %v1913_v23 = vld [vmem:[#allocation2 + $0x218] sm:$0x3]  ;;  %v6444_v22 = vld [vmem:[#allocation2 + $0x210] sm:$0x3]  ;;  %v6462_v36 = vld [vmem:[#allocation2 + $0xe0] sm:$0xff] }
 0x17c   :  { %v830_v43 = vrot.slane %v6248_v28, 3  ;;  %v576_v11 = vsel %vm512_vm3, %v4836_v26, %v4857_v40  ;;  %v4330_v39 = vpack.c.bf16 %v624_v18, %v962_v13  ;;  %v795_v6 = vrot.slane %v6271_v46, 6  ;;  %v6448_v52 = vld [vmem:[#allocation2 + $0x2d0] sm:$0x3]  ;;  %v6456_v10 = vld [vmem:[#allocation2 + $0x2e8] sm:$0x3] }
 0x17d   :  { %v931_v5 = vsel %vm915_vm8, %v914_v16, %v7291_v21  ;;  %v7292_v45 = vmov %v7291_v21  ;;  %v630_v32 = vsel %vm512_vm3, %v612_v24, 0.0  ;;  %v4335_v17 = vpack.c.bf16 %v930_v30, %v879_v37  ;;  %v6450_v16 = vld [vmem:[#allocation2 + $0x28] sm:$0xff]  ;;  %v6458_v18 = vld [vmem:[#allocation2 + $0x20] sm:$0xff]  ;;  %v6468_v30 = vld [vmem:[#allocation2 + $0x2f8] sm:$0x3] }
 0x17e   :  { %v4333_v51 = vpack.c.bf16 %v931_v5, %v880_v61  ;;  %v948_v9 = vsel %vm932_vm5, %v7292_v45, %v796_v33  ;;  %4332 = vmatpush1.bf16.msk.msra.mxu1 %vm5827_vm13, %v4330_v39  ;;  %v829_v28 = vrot.slane %v576_v11, 3  ;;  %v626_v40 = vsel %vm512_vm3, %v6092_v59, %v612_v24  ;;  %v1847_v59 = vld [vmem:[#allocation2 + $0x8] sm:$0xff]  ;;  %v6464_v62 = vld [vmem:[#allocation2 + $0x2e0] sm:$0x3]  ;;  %v6470_v50 = vld [vmem:[#allocation2 + $0x38] sm:$0xff] }
 0x17f   :  { %v965_v25 = vsel %vm949_vm6, %v948_v9, %v830_v43  ;;  %v7293_v26 = vmov %v7288_v3  ;;  %v4343_v48 = vpack.c.bf16 %v1911_v0, %v1847_v59  ;;  %v4345_v60 = vpack.c.bf16 %v1910_v47, %v1846_v41  ;;  %v6466_v3 = vld [vmem:[#allocation2 + $0xf8] sm:$0xff]  ;;  %v6474_v53 = vld [vmem:[#allocation2 + $0xf0] sm:$0xff]  ;;  %v6482_v56 = vld [vmem:[#allocation2 + $0x108] sm:$0xff] }
 0x180   :  { %4334 = vmatprep.subr.bf16.mxu1 %v4333_v51  ;;  %v4337_v1 = vpack.c.bf16 %v630_v32, %v965_v25  ;;  %v947_v46 = vsel %vm932_vm5, %v7293_v26, %v795_v6  ;;  %v4393_v33 = vpack.c.bf16 %v1934_v38, %v1870_v44  ;;  %v4395_v2 = vpack.c.bf16 %v1937_v14, %v1873_v8  ;;  %v6472_v54 = vld [vmem:[#allocation2 + $0x238] sm:$0x3]  ;;  %v6476_v13 = vld [vmem:[#allocation2 + $0x2f0] sm:$0x3]  ;;  %v6484_v5 = vld [vmem:[#allocation2 + $0x308] sm:$0x3] }
 0x181   :  { %4258 = vmatmul.mubr.msk.f32.vlgmr.msra.gmra.mrb[12].mxu1 %vm967_vm11, %v5900_v27  ;;  %v964_v4 = vsel %vm949_vm6, %v947_v46, %v829_v28  ;;  %v6478_v24 = vld [vmem:[#allocation2 + $0x30] sm:$0xff]  ;;  %v6486_v37 = vld [vmem:[#allocation2 + $0x48] sm:$0xff]  ;;  %v4349_v11 = vpack.c.bf16 %v6444_v22, %v6442_v12  ;;  %v6492_v39 = vld [vmem:[#allocation2 + $0x100] sm:$0xff]  ;;  %v7298_v22 = vpack.c.bf16 %v6452_v42, %v6450_v16 }
 0x182   :  { %4336 = vmatpush1.bf16.msra.mxu1 %v4335_v17  ;;  %1566 = vmatprep.mubr.f32.mxu1 %v7195_v55  ;;  %v4340_v31 = vpack.c.bf16 %v626_v40, %v964_v4  ;;  %v4391_v55 = vpack.c.bf16 %v1935_v63, %v1871_v57  ;;  %v6480_v61 = vld [vmem:[#allocation2 + $0x230] sm:$0x3]  ;;  %v6488_v43 = vld [vmem:[#allocation2 + $0x248] sm:$0x3]  ;;  %v6494_v51 = vld [vmem:[#allocation2 + $0x300] sm:$0x3] }
 0x183   :  { %4339 = vmatprep.subr.msk.bf16.mxu1 %vm5827_vm13, %v4337_v1  ;;  %v6496_v45 = vld [vmem:[#allocation2 + $0x40] sm:$0xff]  ;;  %v6508_v25 = vld [vmem:[#allocation2 + $0x118] sm:$0xff] }
 0x184   :  { %4392 = vmatprep.subr.bf16.mxu0 %v4391_v55  ;;  %v6506_v28 = vld [vmem:[#allocation2 + $0x240] sm:$0x3]  ;;  %v6510_v40 = vld [vmem:[#allocation2 + $0x318] sm:$0x3] }
 0x185   :  { %4394 = vmatpush1.bf16.xpose.msra.mxu0 %v4393_v33  ;;  %v6522_v59 = vld [vmem:[#allocation2 + $0x258] sm:$0x3] }
 0x186   :  { %4342 = vmatpush1.bf16.msk.msra.mxu1 %vm5827_vm13, %v4340_v31  ;;  %4396 = vmatprep.subr.bf16.mxu0 %v4395_v2  ;;  %v6520_v31 = vld [vmem:[#allocation2 + $0x58] sm:$0xff] }
 0x187   :  { %4344 = vmatprep.subr.bf16.mxu1 %v4343_v48 }
 0x189   :  { %4261 = vmatmul.mubr.msk.f32.vlgmr.msra.gmra.mrb[14].mxu1 %vm967_vm11, %v5900_v27  ;;  %v4347_v27 = vpack.c.bf16 %v1913_v23, %v1849_v49 }
 0x18f   :  { %4346 = vmatpush1.bf16.xpose.msra.mxu1 %v4345_v60 }
 0x190   :  { %4348 = vmatprep.subr.bf16.mxu1 %v4347_v27 }
 0x209   :  { %v1054_v19 = vpop.f32.mrb[0].mxu1 }
 0x20a   :  { %v1056_v58 = vpop.f32.mrb[1].mxu1  ;;  %v6498_v9 = vmax.f32 %v1054_v19, 0.0 }
 0x20b   :  { %v6512_v1 = vmax.f32 %v1056_v58, 0.0 }
 0x20c   :  { %v1686_v38 = vrot.slane %v6498_v9, 3  ;;  %v1630_v33 = vrot.slane %v6498_v9, 1  ;;  %v1718_v14 = vrot.slane %v6498_v9, 4 }
 0x20d   :  { %v1689_v27 = vrot.slane %v6512_v1, 3  ;;  %v1632_v58 = vrot.slane %v6512_v1, 1  ;;  %v1657_v60 = vrot.slane %v6512_v1, 2  ;;  %v1753_v55 = vrot.slane %v6512_v1, 5 }
 0x21a   :  { %v1125_v35 = vpop.f32.mrb[2].mxu1 }
 0x21b   :  { %v1127_v34 = vpop.f32.mrb[3].mxu1  ;;  %v6540_v44 = vmax.f32 %v1125_v35, 0.0  ;;  %v1721_v35 = vrot.slane %v6512_v1, 4 }
 0x21c   :  { %v6546_v23 = vmax.f32 %v1127_v34, 0.0 }
 0x227   :  { %v1196_v15 = vpop.f32.mrb[4].mxu1 }
 0x228   :  { %v1198_v21 = vpop.f32.mrb[5].mxu1  ;;  %v6559_v63 = vmax.f32 %v1196_v15, 0.0 }
 0x229   :  { %v6564_v4 = vmax.f32 %v1198_v21, 0.0 }
 0x231   :  { %v1267_v8 = vpop.f32.mrb[6].mxu1 }
 0x232   :  { %v1269_v19 = vpop.f32.mrb[7].mxu1  ;;  %v6577_v32 = vmax.f32 %v1267_v8, 0.0 }
 0x233   :  { %v6582_v47 = vmax.f32 %v1269_v19, 0.0 }
 0x23f   :  { %v1355_v41 = vpop.f32.mrb[8].mxu1 }
 0x240   :  { %v1581_v8 = vmax.f32 %v1355_v41, 0.0  ;;  %v1357_v34 = vpop.f32.mrb[9].mxu1 }
 0x241   :  { %v1582_v19 = vmax.f32 %v1357_v34, 0.0 }
 0x242   :  { %v1605_v0 = vrot.slane %v1581_v8, 7  ;;  %v1687_v2 = vrot.slane %v1581_v8, 2  ;;  %v6608_v41 = vsel %vm1606_vm14, %v1581_v8, %v1630_v33  ;;  %v1719_v46 = vrot.slane %v1581_v8, 3 }
 0x243   :  { %v1608_v17 = vrot.slane %v1582_v19, 7  ;;  %v1690_v21 = vrot.slane %v1582_v19, 2  ;;  %v6611_v26 = vsel %vm1606_vm14, %v1582_v19, %v1632_v58  ;;  %v1722_v34 = vrot.slane %v1582_v19, 3 }
 0x244   :  { %v1607_v15 = vsel %vm1606_vm14, %v1605_v0, %v6498_v9  ;;  %v1688_v57 = vsel %vm1606_vm14, %v1687_v2, %v1686_v38  ;;  %v6621_v49 = vsel %vm1606_vm14, %v1719_v46, %v1718_v14  ;;  %v1658_v33 = vrot.slane %v1582_v19, 1 }
 0x245   :  { %v1609_v48 = vsel %vm1606_vm14, %v1608_v17, %v6512_v1  ;;  %v1691_v58 = vsel %vm1606_vm14, %v1690_v21, %v1689_v27  ;;  %v6631_v0 = vsel %vm1606_vm14, %v1722_v34, %v1721_v35  ;;  %v1754_v6 = vrot.slane %v1582_v19, 4 }
 0x246   :  { %2045 = vmatprep.mubr.f32.mxu1 %v1609_v48  ;;  %2885 = vmatprep.mubr.f32.mxu0 %v1691_v58  ;;  %v6636_v46 = vsel %vm1606_vm14, %v1658_v33, %v1657_v60  ;;  %v1655_v38 = vrot.slane %v1581_v8, 1  ;;  %v1751_v14 = vrot.slane %v1581_v8, 4  ;;  %v1786_v17 = vrot.slane %v1582_v19, 5 }
 0x247   :  { %2046 = vmatmul.mubr.f32.vlgmr.msra.gmra.mrb[16].mxu1 %v1607_v15  ;;  %2886 = vmatmul.mubr.f32.vlgmr.msra.gmra.mrb[0].mxu0 %v1688_v57  ;;  %v6641_v27 = vsel %vm1606_vm14, %v1754_v6, %v1753_v55  ;;  %v1783_v35 = vrot.slane %v1581_v8, 5  ;;  %v1818_v21 = vrot.slane %v1582_v19, 6  ;;  %v1815_v48 = vrot.slane %v1581_v8, 6 }
 0x248   :  { %4350 = vmatpush1.bf16.xpose.msra.mxu1 %v4349_v11  ;;  %v7294_v60 = vpack.c.bf16 %v6448_v52, %v6446_v7  ;;  %v7295_v57 = vrot.slane %v6498_v9, 2  ;;  %v7296_v6 = vrot.slane %v6498_v9, 5  ;;  %v7297_v8 = vrot.slane %v6512_v1, 6 }
 0x249   :  { %4352 = vmatprep.subr.bf16.mxu1 %v7298_v22  ;;  %v7299_v7 = vpack.c.bf16 %v6456_v10, %v6454_v20  ;;  %v7300_v52 = vrot.slane %v6498_v9, 6  ;;  %v7301_v33 = vrot.slane %v6512_v1, 7  ;;  %v7305_v20 = vrot.slane %v6540_v44, 1 }
 0x24a   :  { %v1426_v2 = vpop.f32.mrb[10].mxu1  ;;  %4398 = vmatpush1.bf16.xpose.msra.mxu0 %v7294_v60  ;;  %v6654_v15 = vsel %vm1606_vm14, %v1655_v38, %v7295_v57  ;;  %v6659_v55 = vsel %vm1606_vm14, %v1751_v14, %v7296_v6  ;;  %v6664_v19 = vsel %vm1606_vm14, %v1786_v17, %v7297_v8  ;;  %v7303_v14 = vrot.slane %v6498_v9, 7 }
 0x24b   :  { %v6643_v34 = vmax.f32 %v1426_v2, 0.0  ;;  %v1428_v58 = vpop.f32.mrb[11].mxu1  ;;  %4400 = vmatprep.subr.bf16.mxu0 %v7299_v7  ;;  %v6675_v11 = vsel %vm1606_vm14, %v1783_v35, %v7300_v52  ;;  %v6680_v38 = vsel %vm1606_vm14, %v1818_v21, %v7301_v33  ;;  %v7306_v21 = vrot.slane %v6546_v23, 1 }
 0x24c   :  { %v1584_v12 = vmax.f32 %v1428_v58, 0.0  ;;  %7302 = vst [vmem:[#allocation8_spill] sm:$0xff] %v6680_v38  ;;  %v6685_v17 = vsel %vm1606_vm14, %v1815_v48, %v7303_v14  ;;  %v7307_v60 = vrot.slane %v6540_v44, 3  ;;  %v7308_v6 = vrot.slane %v6540_v44, 4 }
 0x24d   :  { %7304 = vst [vmem:[#allocation30_spill] sm:$0xff] %v6685_v17  ;;  %v1610_v16 = vrot.slane %v6643_v34, 7  ;;  %v1693_v42 = vrot.slane %v6643_v34, 2  ;;  %v6693_v10 = vsel %vm1606_vm14, %v6643_v34, %v7305_v20  ;;  %v1725_v1 = vrot.slane %v6643_v34, 3 }
 0x24e   :  { %v1612_v2 = vrot.slane %v1584_v12, 7  ;;  %v1696_v35 = vrot.slane %v1584_v12, 2  ;;  %v6699_v9 = vsel %vm1606_vm14, %v1584_v12, %v7306_v21  ;;  %v1728_v48 = vrot.slane %v1584_v12, 3 }
 0x24f   :  { %v1611_v58 = vsel %vm1606_vm14, %v1610_v16, %v6540_v44  ;;  %v1694_v57 = vsel %vm1606_vm14, %v1693_v42, %v7307_v60  ;;  %v6709_v8 = vsel %vm1606_vm14, %v1725_v1, %v7308_v6  ;;  %v1664_v22 = vrot.slane %v1584_v12, 1 }
 0x250   :  { %v1613_v7 = vsel %vm1606_vm14, %v1612_v2, %v6546_v23  ;;  %v7309_v52 = vrot.slane %v6546_v23, 3  ;;  %v7310_v14 = vrot.slane %v6546_v23, 4  ;;  %v1760_v20 = vrot.slane %v1584_v12, 4 }
 0x251   :  { %2115 = vmatprep.mubr.f32.mxu1 %v1613_v7  ;;  %v7311_v42 = vrot.slane %v6546_v23, 2  ;;  %v1661_v21 = vrot.slane %v6643_v34, 1  ;;  %v1757_v2 = vrot.slane %v6643_v34, 4  ;;  %v1792_v60 = vrot.slane %v1584_v12, 5 }
 0x252   :  { %v1697_v33 = vsel %vm1606_vm14, %v1696_v35, %v7309_v52  ;;  %v6719_v16 = vsel %vm1606_vm14, %v1728_v48, %v7310_v14  ;;  %2116 = vmatmul.mubr.f32.vlgmr.msra.gmra.mrb[16].mxu1 %v1611_v58  ;;  %v7312_v35 = vrot.slane %v6546_v23, 5  ;;  %v1789_v52 = vrot.slane %v6643_v34, 5 }
 0x253   :  { %2955 = vmatprep.mubr.f32.mxu0 %v1697_v33  ;;  %v6724_v1 = vsel %vm1606_vm14, %v1664_v22, %v7311_v42  ;;  %v1824_v33 = vrot.slane %v1584_v12, 6  ;;  %v7313_v42 = vpack.c.bf16 %v6460_v29, %v6458_v18  ;;  %v7314_v58 = vpack.c.bf16 %v6464_v62, %v6462_v36 }
 0x254   :  { %v1497_v6 = vpop.f32.mrb[12].mxu1  ;;  %2956 = vmatmul.mubr.f32.vlgmr.msra.gmra.mrb[0].mxu0 %v1694_v57  ;;  %v6731_v48 = vsel %vm1606_vm14, %v1760_v20, %v7312_v35  ;;  %v7315_v57 = vrot.slane %v6540_v44, 2  ;;  %v7316_v35 = vrot.slane %v6540_v44, 5  ;;  %v7318_v29 = vpack.c.bf16 %v6468_v30, %v6466_v3 }
 0x255   :  { %v6735_v22 = vmax.f32 %v1497_v6, 0.0  ;;  %v1499_v14 = vpop.f32.mrb[13].mxu1  ;;  %4354 = vmatpush1.bf16.xpose.msra.mxu1 %v7313_v42  ;;  %4402 = vmatpush1.bf16.xpose.msra.mxu0 %v7314_v58  ;;  %v7317_v6 = vrot.slane %v6546_v23, 6  ;;  %v7319_v36 = vpack.c.bf16 %v6472_v54, %v6470_v50  ;;  %v7320_v62 = vrot.slane %v6540_v44, 6 }
 0x256   :  { %v6746_v20 = vsel %vm1606_vm14, %v1661_v21, %v7315_v57  ;;  %v6751_v12 = vsel %vm1606_vm14, %v1757_v2, %v7316_v35  ;;  %v6758_v18 = vmax.f32 %v1499_v14, 0.0  ;;  %4404 = vmatprep.subr.bf16.mxu0 %v7318_v29  ;;  %v7323_v30 = vrot.slane %v6559_v63, 1 }
 0x257   :  { %v6756_v7 = vsel %vm1606_vm14, %v1792_v60, %v7317_v6  ;;  %4356 = vmatprep.subr.bf16.mxu1 %v7319_v36  ;;  %v6769_v21 = vsel %vm1606_vm14, %v1789_v52, %v7320_v62  ;;  %v7321_v60 = vrot.slane %v6546_v23, 7  ;;  %v1614_v42 = vrot.slane %v6735_v22, 7 }
 0x258   :  { %v1699_v3 = vrot.slane %v6735_v22, 2  ;;  %v6783_v50 = vsel %vm1606_vm14, %v6735_v22, %v7323_v30  ;;  %v1731_v54 = vrot.slane %v6735_v22, 3  ;;  %v1616_v52 = vrot.slane %v6758_v18, 7 }
 0x259   :  { %v6775_v14 = vsel %vm1606_vm14, %v1824_v33, %v7321_v60  ;;  %v1702_v58 = vrot.slane %v6758_v18, 2  ;;  %v7324_v23 = vrot.slane %v6564_v4, 1  ;;  %v1734_v57 = vrot.slane %v6758_v18, 3 }
 0x25a   :  { %7322 = vst [vmem:[#allocation13_spill] sm:$0xff] %v6775_v14  ;;  %v1615_v35 = vsel %vm1606_vm14, %v1614_v42, %v6559_v63  ;;  %v7325_v6 = vrot.slane %v6559_v63, 3  ;;  %v7326_v36 = vrot.slane %v6559_v63, 4  ;;  %v1670_v60 = vrot.slane %v6758_v18, 1 }
 0x25b   :  { %v6792_v33 = vsel %vm1606_vm14, %v6758_v18, %v7324_v23  ;;  %v1617_v30 = vsel %vm1606_vm14, %v1616_v52, %v6564_v4  ;;  %v7327_v23 = vrot.slane %v6564_v4, 3  ;;  %v7328_v42 = vrot.slane %v6564_v4, 4 }
 0x25c   :  { %v1700_v29 = vsel %vm1606_vm14, %v1699_v3, %v7325_v6  ;;  %v6803_v62 = vsel %vm1606_vm14, %v1731_v54, %v7326_v36  ;;  %v1766_v3 = vrot.slane %v6758_v18, 4  ;;  %2185 = vmatprep.mubr.f32.mxu1 %v1617_v30  ;;  %v7329_v54 = vrot.slane %v6564_v4, 2 }
 0x25d   :  { %v1703_v2 = vsel %vm1606_vm14, %v1702_v58, %v7327_v23  ;;  %v6814_v14 = vsel %vm1606_vm14, %v1734_v57, %v7328_v42  ;;  %v1667_v52 = vrot.slane %v6735_v22, 1  ;;  %v1763_v36 = vrot.slane %v6735_v22, 4  ;;  %2186 = vmatmul.mubr.f32.vlgmr.msra.gmra.mrb[16].mxu1 %v1615_v35  ;;  %v1568_v23 = vpop.f32.mrb[14].mxu1 }
 0x25e   :  { %3025 = vmatprep.mubr.f32.mxu0 %v1703_v2  ;;  %v6820_v6 = vsel %vm1606_vm14, %v1670_v60, %v7329_v54  ;;  %v1798_v58 = vrot.slane %v6758_v18, 5  ;;  %v7330_v57 = vrot.slane %v6564_v4, 5  ;;  %v1795_v2 = vrot.slane %v6735_v22, 5  ;;  %v1570_v35 = vpop.f32.mrb[15].mxu1 }
 0x25f   :  { %3026 = vmatmul.mubr.f32.vlgmr.msra.gmra.mrb[0].mxu0 %v1700_v29  ;;  %v1800_v30 = vrot.slane %v6577_v32, 6  ;;  %v1821_v60 = vrot.slane %v6643_v34, 6  ;;  %v6833_v54 = vmax.f32 %v1568_v23, 0.0  ;;  %v7331_v17 = vpack.c.bf16 %v6476_v13, %v6474_v53 }
 0x260   :  { %v6828_v42 = vsel %vm1606_vm14, %v1766_v3, %v7330_v57  ;;  %v7332_v29 = vpack.c.bf16 %v6480_v61, %v6478_v24  ;;  %v7333_v3 = vrot.slane %v6559_v63, 2  ;;  %v7334_v38 = vrot.slane %v6559_v63, 5 }
 0x261   :  { %4406 = vmatpush1.bf16.xpose.msra.mxu0 %v7331_v17  ;;  %v7335_v23 = vrot.slane %v6564_v4, 6  ;;  %v1588_v13 = vmax.f32 %v1570_v35, 0.0  ;;  %v7337_v24 = vpack.c.bf16 %v6484_v5, %v6482_v56  ;;  %v7338_v61 = vpack.c.bf16 %v6488_v43, %v6486_v37 }
 0x262   :  { %4358 = vmatpush1.bf16.xpose.msra.mxu1 %v7332_v29  ;;  %v6844_v57 = vsel %vm1606_vm14, %v1667_v52, %v7333_v3  ;;  %v6849_v34 = vsel %vm1606_vm14, %v1763_v36, %v7334_v38  ;;  %v7339_v17 = vrot.slane %v6559_v63, 6  ;;  %v7341_v38 = vrot.slane %v6540_v44, 7 }
 0x263   :  { %v6854_v53 = vsel %vm1606_vm14, %v1798_v58, %v7335_v23  ;;  %4408 = vmatprep.subr.bf16.mxu0 %v7337_v24  ;;  %4360 = vmatprep.subr.bf16.mxu1 %v7338_v61  ;;  %v1830_v58 = vrot.slane %v6758_v18, 6  ;;  %v1618_v35 = vrot.slane %v6833_v54, 7  ;;  %v1705_v56 = vrot.slane %v6833_v54, 2 }
 0x264   :  { %7336 = vst [vmem:[#allocation22_spill] sm:$0xff] %v6854_v53  ;;  %v6865_v52 = vsel %vm1606_vm14, %v1795_v2, %v7339_v17  ;;  %v6870_v36 = vsel %vm1606_vm14, %v1821_v60, %v7341_v38  ;;  %v7343_v5 = vrot.slane %v6577_v32, 1  ;;  %v1737_v43 = vrot.slane %v6833_v54, 3 }
 0x265   :  { %7340 = vst [vmem:[#allocation17_spill] sm:$0xff] %v6865_v52  ;;  %7342 = vst [vmem:[#allocation23_spill] sm:$0xff] %v6870_v36  ;;  %v1620_v2 = vrot.slane %v1588_v13, 7  ;;  %v1708_v29 = vrot.slane %v1588_v13, 2  ;;  %v7344_v44 = vrot.slane %v6582_v47, 1  ;;  %v1740_v18 = vrot.slane %v1588_v13, 3 }
 0x266   :  { %v6879_v37 = vsel %vm1606_vm14, %v6833_v54, %v7343_v5  ;;  %v1619_v3 = vsel %vm1606_vm14, %v1618_v35, %v6577_v32  ;;  %v7345_v23 = vrot.slane %v6577_v32, 3  ;;  %v7346_v61 = vrot.slane %v6577_v32, 4 }
 0x267   :  { %v6885_v60 = vsel %vm1606_vm14, %v1588_v13, %v7344_v44  ;;  %v1676_v38 = vrot.slane %v1588_v13, 1  ;;  %v1621_v5 = vsel %vm1606_vm14, %v1620_v2, %v6582_v47  ;;  %v7347_v44 = vrot.slane %v6582_v47, 3 }
 0x268   :  { %v1706_v24 = vsel %vm1606_vm14, %v1705_v56, %v7345_v23  ;;  %v6895_v17 = vsel %vm1606_vm14, %v1737_v43, %v7346_v61  ;;  %v7348_v52 = vrot.slane %v6582_v47, 4  ;;  %v1772_v53 = vrot.slane %v1588_v13, 4  ;;  %2255 = vmatprep.mubr.f32.mxu1 %v1621_v5 }
 0x269   :  { %v1709_v36 = vsel %vm1606_vm14, %v1708_v29, %v7347_v44  ;;  %v7349_v56 = vrot.slane %v6582_v47, 2  ;;  %v1673_v23 = vrot.slane %v6833_v54, 1  ;;  %v1769_v2 = vrot.slane %v6833_v54, 4  ;;  %2256 = vmatmul.mubr.f32.vlgmr.msra.gmra.mrb[16].mxu1 %v1619_v3 }
 0x26a   :  { %v6905_v35 = vsel %vm1606_vm14, %v1740_v18, %v7348_v52  ;;  %3095 = vmatprep.mubr.f32.mxu0 %v1709_v36  ;;  %v1804_v61 = vrot.slane %v1588_v13, 5  ;;  %v7350_v29 = vrot.slane %v6582_v47, 5  ;;  %v1801_v18 = vrot.slane %v6833_v54, 5  ;;  %2325 = vmatprep.mubr.f32.mxu1 %v6611_v26  ;;  %v1883_v26 = vld [vmem:[#allocation2 + $0x128] sm:$0xff] }
 0x26b   :  { %v6910_v43 = vsel %vm1606_vm14, %v1676_v38, %v7349_v56  ;;  %3096 = vmatmul.mubr.f32.vlgmr.msra.gmra.mrb[0].mxu0 %v1706_v24  ;;  %v7351_v36 = vrot.slane %v6564_v4, 7  ;;  %v1835_v38 = vrot.slane %v6582_v47, 7  ;;  %v7352_v44 = vpack.c.bf16 %v6494_v51, %v6492_v39  ;;  %v1880_v24 = vld [vmem:[#allocation2 + $0x110] sm:$0xff] }
 0x26c   :  { %v6917_v52 = vsel %vm1606_vm14, %v1772_v53, %v7350_v29  ;;  %v7353_v3 = vpack.c.bf16 %v6506_v28, %v6496_v45  ;;  %v1944_v53 = vld [vmem:[#allocation2 + $0x310] sm:$0x3]  ;;  %v7354_v56 = vrot.slane %v6577_v32, 2  ;;  %v7355_v4 = vrot.slane %v6577_v32, 5  ;;  %3165 = vmatprep.mubr.f32.mxu0 %v6631_v0 }
 0x26d   :  { %v6923_v5 = vsel %vm1606_vm14, %v1830_v58, %v7351_v36  ;;  %4410 = vmatpush1.bf16.xpose.msra.mxu0 %v7352_v44  ;;  %v7356_v36 = vrot.slane %v6582_v47, 6  ;;  %v1827_v51 = vrot.slane %v6735_v22, 6  ;;  %v1856_v45 = vld [vmem:[#allocation2 + $0x50] sm:$0xff]  ;;  %v1836_v44 = vrot.slane %v1588_v13, 6  ;;  %v1859_v13 = vld [vmem:[#allocation2 + $0x68] sm:$0xff] }
 0x26e   :  { %4362 = vmatpush1.bf16.xpose.msra.mxu1 %v7353_v3  ;;  %v6935_v29 = vsel %vm1606_vm14, %v1673_v23, %v7354_v56  ;;  %v6940_v58 = vsel %vm1606_vm14, %v1769_v2, %v7355_v4  ;;  %v1920_v28 = vld [vmem:[#allocation2 + $0x250] sm:$0x3]  ;;  %v6951_v23 = vsel %vm1606_vm14, %v1801_v18, %v1800_v30  ;;  %v1832_v2 = vrot.slane %v6577_v32, 7  ;;  %v1947_v30 = vld [vmem:[#allocation2 + $0x328] sm:$0x3] }
 0x26f   :  { %v6945_v39 = vsel %vm1606_vm14, %v1804_v61, %v7356_v36  ;;  %v1833_v3 = vrot.slane %v6833_v54, 6  ;;  %v7357_v47 = vpack.c.bf16 %v6510_v40, %v6508_v25  ;;  %v7358_v22 = vpack.c.bf16 %v6522_v59, %v6520_v31  ;;  %v1923_v18 = vld [vmem:[#allocation2 + $0x268] sm:$0x3]  ;;  %v1882_v59 = vld [vmem:[#allocation2 + $0x120] sm:$0xff]  ;;  %v1861_v36 = vld [vmem:[#allocation2 + $0x78] sm:$0xff] }
 0x270   :  { %v7359_v0 = vrot.slane %v6559_v63, 7  ;;  %v6967_v32 = vsel %vm1606_vm14, %v1836_v44, %v1835_v38  ;;  %v4413_v25 = vpack.c.bf16 %v1944_v53, %v1880_v24  ;;  %v4365_v40 = vpack.c.bf16 %v1920_v28, %v1856_v45  ;;  %v1946_v63 = vld [vmem:[#allocation2 + $0x320] sm:$0x3]  ;;  %v1885_v24 = vld [vmem:[#allocation2 + $0x138] sm:$0xff]  ;;  %v1860_v44 = vld [vmem:[#allocation2 + $0x70] sm:$0xff] }
 0x271   :  { %4412 = vmatprep.subr.bf16.mxu0 %v7357_v47  ;;  %4364 = vmatprep.subr.bf16.mxu1 %v7358_v22  ;;  %v6970_v54 = vsel %vm1606_vm14, %v1833_v3, %v1832_v2  ;;  %v4415_v56 = vpack.c.bf16 %v1947_v30, %v1883_v26  ;;  %v4367_v31 = vpack.c.bf16 %v1923_v18, %v1859_v13  ;;  %v1858_v38 = vld [vmem:[#allocation2 + $0x60] sm:$0xff]  ;;  %v1949_v53 = vld [vmem:[#allocation2 + $0x338] sm:$0x3]  ;;  %v1924_v2 = vld [vmem:[#allocation2 + $0x270] sm:$0x3] }
 0x272   :  { %v6964_v61 = vsel %vm1606_vm14, %v1827_v51, %v7359_v0  ;;  %v1922_v4 = vld [vmem:[#allocation2 + $0x260] sm:$0x3]  ;;  %v1925_v51 = vld [vmem:[#allocation2 + $0x278] sm:$0x3]  ;;  %v4417_v45 = vpack.c.bf16 %v1946_v63, %v1882_v59  ;;  %v4419_v28 = vpack.c.bf16 %v1949_v53, %v1885_v24  ;;  %v1887_v3 = vld [vmem:[#allocation2 + $0x148] sm:$0xff] }
 0x273   :  { %v1951_v47 = vld [vmem:[#allocation2 + $0x348] sm:$0x3]  ;;  %v1862_v13 = vld [vmem:[#allocation2 + $0x80] sm:$0xff] }
 0x274   :  { %3166 = vmatmul.mubr.f32.vlgmr.msra.gmra.mrb[0].mxu0 %v6621_v49  ;;  %v4371_v49 = vpack.c.bf16 %v1925_v51, %v1861_v36  ;;  %v1863_v22 = vld [vmem:[#allocation2 + $0x88] sm:$0xff]  ;;  %v4423_v30 = vpack.c.bf16 %v1951_v47, %v1887_v3  ;;  %v1926_v18 = vld [vmem:[#allocation2 + $0x280] sm:$0x3] }
 0x275   :  { %2326 = vmatmul.mubr.f32.vlgmr.msra.gmra.mrb[16].mxu1 %v6608_v41  ;;  %4414 = vmatpush1.bf16.xpose.msra.mxu0 %v4413_v25  ;;  %v4369_v41 = vpack.c.bf16 %v1922_v4, %v1858_v38  ;;  %v1927_v26 = vld [vmem:[#allocation2 + $0x288] sm:$0x3]  ;;  %v1889_v25 = vld [vmem:[#allocation2 + $0x158] sm:$0xff]  ;;  %v1864_v38 = vld [vmem:[#allocation2 + $0x90] sm:$0xff] }
 0x276   :  { %4366 = vmatpush1.bf16.xpose.msra.mxu1 %v4365_v40  ;;  %2395 = vmatprep.mubr.f32.mxu1 %v6699_v9  ;;  %v1884_v9 = vld [vmem:[#allocation2 + $0x130] sm:$0xff]  ;;  %v1953_v40 = vld [vmem:[#allocation2 + $0x358] sm:$0x3]  ;;  %v1891_v24 = vld [vmem:[#allocation2 + $0x168] sm:$0xff] }
 0x277   :  { %3235 = vmatprep.mubr.f32.mxu0 %v6719_v16  ;;  %4416 = vmatprep.subr.bf16.mxu0 %v4415_v56  ;;  %v1948_v16 = vld [vmem:[#allocation2 + $0x330] sm:$0x3]  ;;  %v1865_v56 = vld [vmem:[#allocation2 + $0x98] sm:$0xff]  ;;  %v4427_v63 = vpack.c.bf16 %v1953_v40, %v1889_v25  ;;  %v1955_v53 = vld [vmem:[#allocation2 + $0x368] sm:$0x3] }
 0x278   :  { %4368 = vmatprep.subr.bf16.mxu1 %v4367_v31  ;;  %v4421_v0 = vpack.c.bf16 %v1948_v16, %v1884_v9  ;;  %v1929_v31 = vld [vmem:[#allocation2 + $0x298] sm:$0x3]  ;;  %v1928_v4 = vld [vmem:[#allocation2 + $0x290] sm:$0x3]  ;;  %v1867_v36 = vld [vmem:[#allocation2 + $0xa8] sm:$0xff] }
 0x279   :  { %v1931_v51 = vld [vmem:[#allocation2 + $0x2a8] sm:$0x3]  ;;  %v1893_v9 = vld [vmem:[#allocation2 + $0x178] sm:$0xff]  ;;  %v1898_v40 = vld [vmem:[#allocation2 + $0x1a0] sm:$0xff] }
 0x27a   :  { %v1957_v16 = vld [vmem:[#allocation2 + $0x378] sm:$0x3] }
 0x27b   :  { %v4435_v47 = vpack.c.bf16 %v1957_v16, %v1893_v9  ;;  %v1970_v9 = vld [vmem:[#allocation2 + $0x3e0] sm:$0x3]  ;;  %v1909_v16 = vld [vmem:[#allocation2 + $0x1f8] sm:$0xff] }
 0x27c   :  { %3236 = vmatmul.mubr.f32.vlgmr.msra.gmra.mrb[0].mxu0 %v6709_v8  ;;  %v4375_v8 = vpack.c.bf16 %v1927_v26, %v1863_v22  ;;  %v1868_v22 = vld [vmem:[#allocation2 + $0xb0] sm:$0xff] }
 0x27d   :  { %2396 = vmatmul.mubr.f32.vlgmr.msra.gmra.mrb[16].mxu1 %v6693_v10  ;;  %4418 = vmatpush1.bf16.xpose.msra.mxu0 %v4417_v45  ;;  %v4373_v10 = vpack.c.bf16 %v1924_v2, %v1860_v44  ;;  %v1869_v44 = vld [vmem:[#allocation2 + $0xb8] sm:$0xff]  ;;  %v1932_v26 = vld [vmem:[#allocation2 + $0x2b0] sm:$0x3] }
 0x27e   :  { %4370 = vmatpush1.bf16.xpose.msra.mxu1 %v4369_v41  ;;  %2465 = vmatprep.mubr.f32.mxu1 %v6792_v33  ;;  %v1950_v33 = vld [vmem:[#allocation2 + $0x340] sm:$0x3]  ;;  %v4431_v41 = vpack.c.bf16 %v1955_v53, %v1891_v24  ;;  %v1933_v2 = vld [vmem:[#allocation2 + $0x2b8] sm:$0x3] }
 0x27f   :  { %3305 = vmatprep.mubr.f32.mxu0 %v6814_v14  ;;  %4420 = vmatprep.subr.bf16.mxu0 %v4419_v28  ;;  %v1886_v14 = vld [vmem:[#allocation2 + $0x140] sm:$0xff]  ;;  %v1905_v24 = vld [vmem:[#allocation2 + $0x1d8] sm:$0xff] }
 0x280   :  { %4372 = vmatprep.subr.bf16.mxu1 %v4371_v49  ;;  %v4425_v59 = vpack.c.bf16 %v1950_v33, %v1886_v14  ;;  %v1866_v28 = vld [vmem:[#allocation2 + $0xa0] sm:$0xff] }
 0x281   :  { %v1930_v49 = vld [vmem:[#allocation2 + $0x2a0] sm:$0x3] }
 0x284   :  { %3306 = vmatmul.mubr.f32.vlgmr.msra.gmra.mrb[0].mxu0 %v6803_v62  ;;  %v4379_v62 = vpack.c.bf16 %v1929_v31, %v1865_v56  ;;  %v1901_v56 = vld [vmem:[#allocation2 + $0x1b8] sm:$0xff] }
 0x285   :  { %2466 = vmatmul.mubr.f32.vlgmr.msra.gmra.mrb[16].mxu1 %v6783_v50  ;;  %4422 = vmatpush1.bf16.xpose.msra.mxu0 %v4421_v0  ;;  %v4377_v50 = vpack.c.bf16 %v1926_v18, %v1862_v13  ;;  %v1895_v0 = vld [vmem:[#allocation2 + $0x188] sm:$0xff] }
 0x286   :  { %4374 = vmatpush1.bf16.xpose.msra.mxu1 %v4373_v10  ;;  %2535 = vmatprep.mubr.f32.mxu1 %v6885_v60  ;;  %v1888_v60 = vld [vmem:[#allocation2 + $0x150] sm:$0xff]  ;;  %v1959_v10 = vld [vmem:[#allocation2 + $0x388] sm:$0x3] }
 0x287   :  { %3375 = vmatprep.mubr.f32.mxu0 %v6905_v35  ;;  %4424 = vmatprep.subr.bf16.mxu0 %v4423_v30  ;;  %v1952_v35 = vld [vmem:[#allocation2 + $0x350] sm:$0x3]  ;;  %v4439_v14 = vpack.c.bf16 %v1959_v10, %v1895_v0  ;;  %v1963_v18 = vld [vmem:[#allocation2 + $0x3a8] sm:$0x3] }
 0x288   :  { %4376 = vmatprep.subr.bf16.mxu1 %v4375_v8  ;;  %v4429_v45 = vpack.c.bf16 %v1952_v35, %v1888_v60  ;;  %v4389_v8 = vpack.c.bf16 %v1932_v26, %v1868_v22  ;;  %v4262_v22 = vld [vmem:[%s7036_s3] ss:$0 sm:$0xff] }
 0x28c   :  { %3376 = vmatmul.mubr.f32.vlgmr.msra.gmra.mrb[0].mxu0 %v6895_v17  ;;  %v4383_v17 = vpack.c.bf16 %v1931_v51, %v1867_v36  ;;  %v7362_v51 = vld [vmem:[#allocation8_spill] sm:$0xff] }
 0x28d   :  { %2536 = vmatmul.mubr.f32.vlgmr.msra.gmra.mrb[16].mxu1 %v6879_v37  ;;  %4426 = vmatpush1.bf16.xpose.msra.mxu0 %v4425_v59  ;;  %v4381_v37 = vpack.c.bf16 %v1928_v4, %v1864_v38  ;;  %v1902_v38 = vld [vmem:[#allocation2 + $0x1c0] sm:$0xff] }
 0x28e   :  { %4378 = vmatpush1.bf16.xpose.msra.mxu1 %v4377_v50  ;;  %2605 = vmatprep.mubr.f32.mxu1 %v6636_v46  ;;  %v1890_v46 = vld [vmem:[#allocation2 + $0x160] sm:$0xff]  ;;  %v1900_v50 = vld [vmem:[#allocation2 + $0x1b0] sm:$0xff] }
 0x28f   :  { %3445 = vmatprep.mubr.f32.mxu0 %v6641_v27  ;;  %4428 = vmatprep.subr.bf16.mxu0 %v4427_v63  ;;  %v1954_v27 = vld [vmem:[#allocation2 + $0x360] sm:$0x3]  ;;  %v1964_v63 = vld [vmem:[#allocation2 + $0x3b0] sm:$0x3] }
 0x290   :  { %4380 = vmatprep.subr.bf16.mxu1 %v4379_v62  ;;  %v4433_v3 = vpack.c.bf16 %v1954_v27, %v1890_v46  ;;  %v1903_v62 = vld [vmem:[#allocation2 + $0x1c8] sm:$0xff]  ;;  %v4453_v60 = vpack.c.bf16 %v1964_v63, %v1900_v50  ;;  %v1966_v4 = vld [vmem:[#allocation2 + $0x3c0] sm:$0x3] }
 0x291   :  { %v4457_v53 = vpack.c.bf16 %v1966_v4, %v1902_v38 }
 0x294   :  { %3446 = vmatmul.mubr.f32.vlgmr.msra.gmra.mrb[0].mxu0 %v6659_v55  ;;  %v4387_v55 = vpack.c.bf16 %v1933_v2, %v1869_v44 }
 0x295   :  { %2606 = vmatmul.mubr.f32.vlgmr.msra.gmra.mrb[16].mxu1 %v6654_v15  ;;  %4430 = vmatpush1.bf16.xpose.msra.mxu0 %v4429_v45  ;;  %v4385_v15 = vpack.c.bf16 %v1930_v49, %v1866_v28  ;;  %v1904_v45 = vld [vmem:[#allocation2 + $0x1d0] sm:$0xff]  ;;  %v1906_v49 = vld [vmem:[#allocation2 + $0x1e0] sm:$0xff] }
 0x296   :  { %4382 = vmatpush1.bf16.xpose.msra.mxu1 %v4381_v37  ;;  %2675 = vmatprep.mubr.f32.mxu1 %v6724_v1  ;;  %v1892_v1 = vld [vmem:[#allocation2 + $0x170] sm:$0xff]  ;;  %v4465_v44 = vpack.c.bf16 %v1970_v9, %v1906_v49 }
 0x297   :  { %3515 = vmatprep.mubr.f32.mxu0 %v6731_v48  ;;  %4432 = vmatprep.subr.bf16.mxu0 %v4431_v41  ;;  %v1956_v48 = vld [vmem:[#allocation2 + $0x370] sm:$0x3]  ;;  %v1907_v41 = vld [vmem:[#allocation2 + $0x1e8] sm:$0xff] }
 0x298   :  { %4384 = vmatprep.subr.bf16.mxu1 %v4383_v17  ;;  %v4437_v30 = vpack.c.bf16 %v1956_v48, %v1892_v1  ;;  %v1968_v37 = vld [vmem:[#allocation2 + $0x3d0] sm:$0x3]  ;;  %v1971_v17 = vld [vmem:[#allocation2 + $0x3e8] sm:$0x3] }
 0x299   :  { %v4461_v46 = vpack.c.bf16 %v1968_v37, %v1904_v45  ;;  %v4463_v27 = vpack.c.bf16 %v1971_v17, %v1907_v41  ;;  %v7364_v28 = vld [vmem:[#allocation13_spill] sm:$0xff] }
 0x29c   :  { %3516 = vmatmul.mubr.f32.vlgmr.msra.gmra.mrb[0].mxu0 %v6751_v12  ;;  %v1958_v12 = vld [vmem:[#allocation2 + $0x380] sm:$0x3] }
 0x29d   :  { %2676 = vmatmul.mubr.f32.vlgmr.msra.gmra.mrb[16].mxu1 %v6746_v20  ;;  %4434 = vmatpush1.bf16.xpose.msra.mxu0 %v4433_v3  ;;  %v1894_v20 = vld [vmem:[#allocation2 + $0x180] sm:$0xff] }
 0x29e   :  { %4386 = vmatpush1.bf16.xpose.msra.mxu1 %v4385_v15  ;;  %2745 = vmatprep.mubr.f32.mxu1 %v6820_v6  ;;  %v1897_v6 = vld [vmem:[#allocation2 + $0x198] sm:$0xff]  ;;  %v4441_v33 = vpack.c.bf16 %v1958_v12, %v1894_v20  ;;  %v1908_v15 = vld [vmem:[#allocation2 + $0x1f0] sm:$0xff] }
 0x29f   :  { %3585 = vmatprep.mubr.f32.mxu0 %v6828_v42  ;;  %4436 = vmatprep.subr.bf16.mxu0 %v4435_v47  ;;  %v1961_v42 = vld [vmem:[#allocation2 + $0x398] sm:$0x3]  ;;  %v7365_v3 = vld [vmem:[#allocation23_spill] sm:$0xff]  ;;  %v1972_v47 = vld [vmem:[#allocation2 + $0x3f0] sm:$0x3] }
 0x2a0   :  { %4388 = vmatprep.subr.bf16.mxu1 %v4387_v55  ;;  %v4443_v13 = vpack.c.bf16 %v1961_v42, %v1897_v6  ;;  %v4469_v55 = vpack.c.bf16 %v1972_v47, %v1908_v15 }
 0x2a4   :  { %3586 = vmatmul.mubr.f32.vlgmr.msra.gmra.mrb[0].mxu0 %v6849_v34  ;;  %v1960_v34 = vld [vmem:[#allocation2 + $0x390] sm:$0x3] }
 0x2a5   :  { %2746 = vmatmul.mubr.f32.vlgmr.msra.gmra.mrb[16].mxu1 %v6844_v57  ;;  %4438 = vmatpush1.bf16.xpose.msra.mxu0 %v4437_v30  ;;  %v1896_v57 = vld [vmem:[#allocation2 + $0x190] sm:$0xff] }
 0x2a6   :  { %4390 = vmatpush1.bf16.xpose.msra.mxu1 %v4389_v8  ;;  %2815 = vmatprep.mubr.f32.mxu1 %v6910_v43  ;;  %v1899_v43 = vld [vmem:[#allocation2 + $0x1a8] sm:$0xff] }
 0x2a7   :  { %3655 = vmatprep.mubr.f32.mxu0 %v6917_v52  ;;  %4440 = vmatprep.subr.bf16.mxu0 %v4439_v14  ;;  %v4445_v52 = vpack.c.bf16 %v1960_v34, %v1896_v57  ;;  %v4447_v25 = vpack.c.bf16 %v1963_v18, %v1899_v43 }
 0x2ac   :  { %3656 = vmatmul.mubr.f32.vlgmr.msra.gmra.mrb[0].mxu0 %v6940_v58  ;;  %v1965_v58 = vld [vmem:[#allocation2 + $0x3b8] sm:$0x3] }
 0x2ad   :  { %2816 = vmatmul.mubr.f32.vlgmr.msra.gmra.mrb[16].mxu1 %v6935_v29  ;;  %4442 = vmatpush1.bf16.xpose.msra.mxu0 %v4441_v33  ;;  %v1962_v29 = vld [vmem:[#allocation2 + $0x3a0] sm:$0x3]  ;;  %v4451_v59 = vpack.c.bf16 %v1965_v58, %v1901_v56 }
 0x2ae   :  { %3725 = vmatprep.mubr.f32.mxu0 %v6664_v19  ;;  %4444 = vmatprep.subr.bf16.mxu0 %v4443_v13  ;;  %v4449_v31 = vpack.c.bf16 %v1962_v29, %v1898_v40  ;;  %v7360_v19 = vld [vmem:[#allocation22_spill] sm:$0xff] }
 0x2b4   :  { %3726 = vmatmul.mubr.f32.vlgmr.msra.gmra.mrb[0].mxu0 %v6675_v11  ;;  %v1967_v11 = vld [vmem:[#allocation2 + $0x3c8] sm:$0x3] }
 0x2b5   :  { %4446 = vmatpush1.bf16.xpose.msra.mxu0 %v4445_v52  ;;  %3795 = vmatprep.mubr.f32.mxu0 %v6756_v7  ;;  %v4455_v35 = vpack.c.bf16 %v1967_v11, %v1903_v62  ;;  %v7361_v7 = vld [vmem:[#allocation17_spill] sm:$0xff] }
 0x2b6   :  { %4448 = vmatprep.subr.bf16.mxu0 %v4447_v25 }
 0x2bc   :  { %3796 = vmatmul.mubr.f32.vlgmr.msra.gmra.mrb[0].mxu0 %v6769_v21  ;;  %v1969_v21 = vld [vmem:[#allocation2 + $0x3d8] sm:$0x3] }
 0x2bd   :  { %4450 = vmatpush1.bf16.xpose.msra.mxu0 %v4449_v31  ;;  %3865 = vmatprep.mubr.f32.mxu0 %v7360_v19  ;;  %v4459_v36 = vpack.c.bf16 %v1969_v21, %v1905_v24 }
 0x2be   :  { %4452 = vmatprep.subr.bf16.mxu0 %v4451_v59 }
 0x2c4   :  { %3866 = vmatmul.mubr.f32.vlgmr.msra.gmra.mrb[0].mxu0 %v7361_v7 }
 0x2c5   :  { %4454 = vmatpush1.bf16.xpose.msra.mxu0 %v4453_v60  ;;  %3935 = vmatprep.mubr.f32.mxu0 %v6945_v39  ;;  %v7363_v39 = vld [vmem:[#allocation30_spill] sm:$0xff] }
 0x2c6   :  { %4456 = vmatprep.subr.bf16.mxu0 %v4455_v35 }
 0x2cc   :  { %3936 = vmatmul.mubr.f32.vlgmr.msra.gmra.mrb[0].mxu0 %v6951_v23  ;;  %v1973_v23 = vld [vmem:[#allocation2 + $0x3f8] sm:$0x3] }
 0x2cd   :  { %4458 = vmatpush1.bf16.xpose.msra.mxu0 %v4457_v53  ;;  %4005 = vmatprep.mubr.f32.mxu0 %v7362_v51  ;;  %v4467_v2 = vpack.c.bf16 %v1973_v23, %v1909_v16 }
 0x2ce   :  { %4460 = vmatprep.subr.bf16.mxu0 %v4459_v36 }
 0x2d4   :  { %4006 = vmatmul.mubr.f32.vlgmr.msra.gmra.mrb[0].mxu0 %v7363_v39 }
 0x2d5   :  { %4462 = vmatpush1.bf16.xpose.msra.mxu0 %v4461_v46  ;;  %4075 = vmatprep.mubr.f32.mxu0 %v7364_v28 }
 0x2d6   :  { %4464 = vmatprep.subr.bf16.mxu0 %v4463_v27 }
 0x2dc   :  { %4076 = vmatmul.mubr.f32.vlgmr.msra.gmra.mrb[0].mxu0 %v7365_v3 }
 0x2dd   :  { %4466 = vmatpush1.bf16.xpose.msra.mxu0 %v4465_v44  ;;  %4145 = vmatprep.mubr.f32.mxu0 %v6923_v5 }
 0x2de   :  { %4468 = vmatprep.subr.bf16.mxu0 %v4467_v2 }
 0x2e4   :  { %4146 = vmatmul.mubr.f32.vlgmr.msra.gmra.mrb[0].mxu0 %v6964_v61 }
 0x2e5   :  { %4470 = vmatpush1.bf16.xpose.msra.mxu0 %v4469_v55  ;;  %4215 = vmatprep.mubr.f32.mxu0 %v6967_v32 }
 0x2ec   :  { %4216 = vmatmul.mubr.f32.vlgmr.msra.gmra.mrb[0].mxu0 %v6970_v54 }
 0x380   :  { %v2817_v1 = vpop.f32.mrb[16].mxu1 }
 0x381   :  { %v2819_v48 = vpop.f32.mrb[17].mxu1  ;;  %v4471_v5 = vadd.f32 %v4262_v22, %v2817_v1 }
 0x3bf   :  { %v4217_v26 = vpop.f32.mrb[0].mxu0 }
 0x3c0   :  { %v4472_v0 = vadd.f32 %v4471_v5, %v4217_v26  ;;  %v4219_v10 = vpop.f32.mrb[1].mxu0 }
 0x3c2   :  { %4222 = vst.msk [vmem:[#allocation5] sm:$0x3] %vm4221_vm15, %v4472_v0 }
 0x3c3   :  { %4913 = shalt.err (!%p4910_p12)
}
 0x3c4   :  { %s4914_s3 = scalar_lea.hbm %s7037_s4, 32 }
 0x3c5   :  { %p4915_p13 = scmp.ne.s32.totalorder %s7037_s4, %s4914_s3  ;;  %p4918_p0 = scmp.lt.u32.totalorder %s4914_s3, %s7037_s4 }
 0x3c7   :  { %p4920_p1 = pnand %p4918_p0, %p4915_p13 }
 0x3c9   :  { %4923 = shalt.err (!%p4920_p1)
}
 0x3ca   :  { %4232 = dma.vmem_to_hbm [thread:$0]  %s4230_s10, 32, %s7037_s4, [#allocation4]  }
 0x3cb   :  { %4926 = dma.done.wait [#allocation4], 32  }
 0x3cc   :  { %4927 = vsyncadd [#allocation4], 4294967264 }
 0x3cd   :  { %4236 = vsyncpa [#allocation3], 1 }
 0x3ce   :  { %4237 = vsyncpa [#allocation4], 1 }

</bundles_post_ra>
